<compile_context>
chip_gen: v7x
topology: tpu7x:2x2x1
jax: 0.10.0
libtpu: 0.0.40
codegen_flags: <defaults>
</compile_context>

<pallas_src>
import functools

import jax
import jax.numpy as jnp
from jax.experimental import pallas as pl
from jax.experimental.pallas import tpu as pltpu


LANES = 128  # lane-dense padding for the output slab


# ----------------------------- fused Pallas kernel ---------------------------

def _make_fused_kernel(num_layers, T, B_pad, H, group, sel, n_sel):
    """Builds a kernel computing the whole ValidateLSTM forward in one invocation.

    Ref order: x2d, (w_ihT, w_hhT, bias) * num_layers, lin_wT, lin_b, out.
      x2d    : (T*B_pad, Din)   time-major rows (row = t*B_pad + b), batch padded
      w_ihT  : (Din_l, 4H)      transposed input weights of layer l
      w_hhT  : (H, 4H)          transposed recurrent weights
      bias   : (1, 4H)          b_ih + b_hh
      lin_wT : (H, O_pad), lin_b : (1, O_pad)   output dim zero-padded to 128 lanes
      out    : (n_sel*B_pad, O_pad)  row = g*B_pad + b (reordered by the wrapper)
    """
    G4 = 4 * H

    def kernel(*refs):
        x_ref = refs[0]
        lin_w_ref = refs[1 + 3 * num_layers]
        lin_b_ref = refs[2 + 3 * num_layers]
        out_ref = refs[3 + 3 * num_layers]

        # tanh(z) == 2*sigmoid(2z) - 1: scale the g-gate columns by 2 ONCE (off the
        # serial path) so each step needs a single full-width sigmoid over the gates
        # instead of 3 sigmoids + 1 tanh worth of EUP launches.
        lane = jax.lax.broadcasted_iota(jnp.int32, (1, G4), 1)
        gscale = jnp.where((lane >= 2 * H) & (lane < 3 * H),
                           jnp.float32(2.0), jnp.float32(1.0))

        w_ih, w_hh, bias = [], [], []
        for l in range(num_layers):
            w_ih.append(refs[1 + 3 * l][...] * gscale)
            w_hh.append(refs[2 + 3 * l][...] * gscale)
            bias.append(refs[3 + 3 * l][...] * gscale)

        # Layer-0 input projection (+ bias) hoisted out of the recurrence as one
        # batched MXU matmul; each per-step slice below is an aligned (8,128) tile.
        xw0 = jnp.dot(x_ref[...], w_ih[0],
                      preferred_element_type=jnp.float32) + bias[0]   # (T*B_pad, 4H)

        def cell(gates, c_prev):
            act = jax.nn.sigmoid(gates)                 # 1 EUP op over all 4H lanes
            i_g = act[:, 0:H]
            f_g = act[:, H:2 * H]
            g_g = 2.0 * act[:, 2 * H:3 * H] - 1.0       # == tanh(g preactivation)
            o_g = act[:, 3 * H:4 * H]
            c_new = f_g * c_prev + i_g * g_g
            h_new = o_g * jnp.tanh(c_new)
            return h_new, c_new

        h = [jnp.zeros((B_pad, H), jnp.float32) for _ in range(num_layers)]
        c = [jnp.zeros((B_pad, H), jnp.float32) for _ in range(num_layers)]
        sel_hs = []

        # Wavefront over (time, layer): layer l's step t depends only on layer l-1's
        # step-t output and its own step-(t-1) state, so the dependent-matmul chain
        # is T + num_layers - 1 deep (vs num_layers*T in the layer-by-layer version).
        # We rely on Mosaic to hoist the W_hh / W_ih weight pushes across the
        # statically-unrolled steps (T is small).
        for t in range(T):
            gates0 = xw0[t * B_pad:(t + 1) * B_pad, :] + jnp.dot(
                h[0], w_hh[0], preferred_element_type=jnp.float32)
            h[0], c[0] = cell(gates0, c[0])
            for l in range(1, num_layers):
                gates = (jnp.dot(h[l - 1], w_ih[l],
                                 preferred_element_type=jnp.float32)
                         + jnp.dot(h[l], w_hh[l],
                                   preferred_element_type=jnp.float32)
                         + bias[l])
                h[l], c[l] = cell(gates, c[l])
            if t % group == sel:
                # Only timesteps surviving the cutoff selection are kept live.
                sel_hs.append(h[num_layers - 1])

        # Merged, lane-dense epilogue: one (n_sel*B_pad, H) @ (H, 128) matmul and a
        # single unmasked (n_sel*B_pad, 128) store instead of n_sel narrow writes.
        hs = jnp.concatenate(sel_hs, axis=0)                     # (n_sel*B_pad, H)
        out_ref[...] = jnp.dot(hs, lin_w_ref[...],
                               preferred_element_type=jnp.float32) + lin_b_ref[...]

    return kernel


def fused_validate_lstm(x2d, lstm_params, lin_wT_pad, lin_b_pad,
                        *, T, B, B_pad, H, O, cutoff):
    group = cutoff + 1
    n_sel = T // group
    sel = (cutoff - 1) % group          # matches PyTorch's (possibly negative) index
    num_layers = len(lstm_params)
    O_pad = lin_wT_pad.shape[1]

    flat_params = []
    for p in lstm_params:
        flat_params.extend(p)

    Din = x2d.shape[1]
    flops = (2 * T * B_pad * Din * 4 * H                         # hoisted layer-0 proj
             + (num_layers - 1) * T * 2 * B_pad * H * 4 * H      # deeper input matmuls
             + num_layers * T * 2 * B_pad * H * 4 * H            # recurrent matmuls
             + 2 * n_sel * B_pad * H * O_pad)                    # merged output linear
    transcendentals = num_layers * T * B_pad * (4 * H + H)
    bytes_accessed = (sum(int(a.size) * a.dtype.itemsize
                          for a in (x2d, lin_wT_pad, lin_b_pad, *flat_params))
                      + n_sel * B_pad * O_pad * 4)

    out2d = pl.pallas_call(
        _make_fused_kernel(num_layers, T, B_pad, H, group, sel, n_sel),
        out_shape=jax.ShapeDtypeStruct((n_sel * B_pad, O_pad), jnp.float32),
        cost_estimate=pl.CostEstimate(flops=flops,
                                      transcendentals=transcendentals,
                                      bytes_accessed=bytes_accessed),
        compiler_params=pltpu.CompilerParams(vmem_limit_bytes=16 * 1024 * 1024),
    )(x2d, *flat_params, lin_wT_pad, lin_b_pad)

    # (n_sel*B_pad, 128) slab -> (B*n_sel, O): drop batch/lane padding and reorder to
    # the reference's row order b*n_sel + g.  Tiny XLA ops on a 16x128 array.
    out3 = out2d.reshape(n_sel, B_pad, O_pad)[:, :B, :O]
    return jnp.swapaxes(out3, 0, 1).reshape(B * n_sel, O)


@functools.partial(jax.jit, static_argnames=("cutoff", "hidden_size", "output_size"))
def validate_lstm_forward(x_btd, lstm_params, lin_wT, lin_b,
                          cutoff, hidden_size, output_size):
    """Matches ValidateLSTM.forward.  x_btd: (B, T, input_size), batch_first."""
    B, T, Din = x_btd.shape
    group = cutoff + 1
    # TODO(synk): the PyTorch source indexes the 2-D `stacked_outputs` with 3 indices
    # (an IndexError as written); we implement the evident intent: reshape to
    # (-1, cutoff+1, output_size) and take position cutoff-1 of each group.
    assert T % group == 0, (
        "fused cutoff selection assumes seq_len % (cutoff + 1) == 0 so groups do not "
        "straddle batch rows")
    O = output_size
    B_pad = max(8, ((B + 7) // 8) * 8)            # sublane-align the batch dim
    O_pad = ((O + LANES - 1) // LANES) * LANES    # lane-dense output columns

    # Time-major rows with the batch zero-padded to B_pad, so each per-timestep slice
    # inside the kernel is exactly one (8, 128)-aligned tile.
    x_tbd = jnp.transpose(x_btd, (1, 0, 2))                      # (T, B, Din)
    x_pad = jnp.pad(x_tbd, ((0, 0), (0, B_pad - B), (0, 0)))     # (T, B_pad, Din)
    x2d = x_pad.reshape(T * B_pad, Din)

    lin_wT_pad = jnp.pad(lin_wT, ((0, 0), (0, O_pad - O)))       # (H, O_pad)
    lin_b_pad = jnp.pad(lin_b, ((0, 0), (0, O_pad - O)))         # (1, O_pad)

    return fused_validate_lstm(x2d, lstm_params, lin_wT_pad, lin_b_pad,
                               T=T, B=B, B_pad=B_pad, H=hidden_size, O=O,
                               cutoff=cutoff)


# ----------------------------- params & reference ----------------------------

def init_params(key, input_size, hidden_size, num_layers, output_size):
    """Deterministic PyTorch-style uniform(-1/sqrt(H), 1/sqrt(H)) init."""
    k = 1.0 / float(hidden_size) ** 0.5
    lstm_params = []
    for layer in range(num_layers):
        din = input_size if layer == 0 else hidden_size
        key, k1, k2, k3, k4 = jax.random.split(key, 5)
        w_ih = jax.random.uniform(k1, (4 * hidden_size, din),
                                  minval=-k, maxval=k, dtype=jnp.float32)
        w_hh = jax.random.uniform(k2, (4 * hidden_size, hidden_size),
                                  minval=-k, maxval=k, dtype=jnp.float32)
        b_ih = jax.random.uniform(k3, (4 * hidden_size,),
                                  minval=-k, maxval=k, dtype=jnp.float32)
        b_hh = jax.random.uniform(k4, (4 * hidden_size,),
                                  minval=-k, maxval=k, dtype=jnp.float32)
        lstm_params.append((w_ih.T, w_hh.T, (b_ih + b_hh)[None, :]))
    key, k5, k6 = jax.random.split(key, 3)
    lin_w = jax.random.uniform(k5, (output_size, hidden_size),
                               minval=-k, maxval=k, dtype=jnp.float32)
    lin_b = jax.random.uniform(k6, (output_size,),
                               minval=-k, maxval=k, dtype=jnp.float32)
    return lstm_params, lin_w.T, lin_b[None, :]


def reference_forward(x_btd, lstm_params, lin_wT, lin_b, cutoff, H, O):
    """Pure-JAX reference (same math, no Pallas)."""
    B, T, _ = x_btd.shape
    h_seq = x_btd
    for (w_ihT, w_hhT, b) in lstm_params:
        h = jnp.zeros((B, H), jnp.float32)
        c = jnp.zeros((B, H), jnp.float32)
        outs = []
        for t in range(T):
            gates = h_seq[:, t, :] @ w_ihT + h @ w_hhT + b
            i_g = jax.nn.sigmoid(gates[:, :H])
            f_g = jax.nn.sigmoid(gates[:, H:2 * H])
            g_g = jnp.tanh(gates[:, 2 * H:3 * H])
            o_g = jax.nn.sigmoid(gates[:, 3 * H:])
            c = f_g * c + i_g * g_g
            h = o_g * jnp.tanh(c)
            outs.append(h)
        h_seq = jnp.stack(outs, axis=1)
    stacked = h_seq.reshape(-1, H) @ lin_wT + lin_b
    return stacked.reshape(-1, cutoff + 1, O)[:, cutoff - 1, :]


# ----------------------------- main -------------------------------------------

if __name__ == "__main__":
    batch, seq = 2, 8
    input_size, hidden_size, num_layers, output_size, cutoff = 8, 32, 2, 4, 3

    key = jax.random.PRNGKey(0)
    key, kx, kp = jax.random.split(key, 3)
    x = jax.random.normal(kx, (batch, seq, input_size), dtype=jnp.float32)

    lstm_params, lin_wT, lin_b = init_params(
        kp, input_size, hidden_size, num_layers, output_size)

    out = validate_lstm_forward(x, tuple(lstm_params), lin_wT, lin_b,
                                cutoff, hidden_size, output_size)
    out = jax.block_until_ready(out)

    ref = reference_forward(x, lstm_params, lin_wT, lin_b,
                            cutoff, hidden_size, output_size)
    assert out.shape == (batch * seq // (cutoff + 1), output_size), out.shape
    assert jnp.allclose(out, ref, rtol=1e-3, atol=1e-3), "mismatch vs reference"

    print("KERNEL_OK")
</pallas_src>

<mosaic_0001>
module attributes {stable_mosaic.version = 11 : i64} {
  func.func @kernel(%arg0: memref<64x8xf32, #tpu.memory_space<vmem>>, %arg1: memref<8x128xf32, #tpu.memory_space<vmem>>, %arg2: memref<32x128xf32, #tpu.memory_space<vmem>>, %arg3: memref<1x128xf32, #tpu.memory_space<vmem>>, %arg4: memref<32x128xf32, #tpu.memory_space<vmem>>, %arg5: memref<32x128xf32, #tpu.memory_space<vmem>>, %arg6: memref<1x128xf32, #tpu.memory_space<vmem>>, %arg7: memref<32x128xf32, #tpu.memory_space<vmem>>, %arg8: memref<1x128xf32, #tpu.memory_space<vmem>>, %arg9: memref<16x128xf32, #tpu.memory_space<vmem>>) attributes {dimension_semantics = [], scalar_prefetch = 0 : i64, scratch_operands = 0 : i64, tpu.core_type = #tpu.core_type<tc>} {
    %0 = tpu.iota {dimensions = array<i32: 1>} : vector<1x128xi32>
    %c64_i32 = arith.constant 64 : i32
    %1 = vector.broadcast %c64_i32 : i32 to vector<1x128xi32>
    %2 = arith.cmpi sge, %0, %1 : vector<1x128xi32>
    %c96_i32 = arith.constant 96 : i32
    %3 = vector.broadcast %c96_i32 : i32 to vector<1x128xi32>
    %4 = arith.cmpi slt, %0, %3 : vector<1x128xi32>
    %5 = arith.andi %2, %4 : vector<1x128xi1>
    %cst = arith.constant 2.000000e+00 : f32
    %cst_0 = arith.constant 1.000000e+00 : f32
    %6 = vector.broadcast %cst : f32 to vector<1x128xf32>
    %7 = vector.broadcast %cst_0 : f32 to vector<1x128xf32>
    %8 = arith.select %5, %6, %7 : vector<1x128xi1>, vector<1x128xf32>
    %c0 = arith.constant 0 : index
    %c0_1 = arith.constant 0 : index
    %9 = vector.load %arg1[%c0, %c0_1] : memref<8x128xf32, #tpu.memory_space<vmem>>, vector<8x128xf32>
    %10 = vector.broadcast %8 : vector<1x128xf32> to vector<8x128xf32>
    %11 = arith.mulf %9, %10 : vector<8x128xf32>
    %c0_2 = arith.constant 0 : index
    %c0_3 = arith.constant 0 : index
    %12 = vector.load %arg2[%c0_2, %c0_3] : memref<32x128xf32, #tpu.memory_space<vmem>>, vector<32x128xf32>
    %13 = vector.broadcast %8 : vector<1x128xf32> to vector<32x128xf32>
    %14 = arith.mulf %12, %13 : vector<32x128xf32>
    %c0_4 = arith.constant 0 : index
    %c0_5 = arith.constant 0 : index
    %15 = vector.load %arg3[%c0_4, %c0_5] : memref<1x128xf32, #tpu.memory_space<vmem>>, vector<1x128xf32>
    %16 = arith.mulf %15, %8 : vector<1x128xf32>
    %c0_6 = arith.constant 0 : index
    %c0_7 = arith.constant 0 : index
    %17 = vector.load %arg4[%c0_6, %c0_7] : memref<32x128xf32, #tpu.memory_space<vmem>>, vector<32x128xf32>
    %18 = vector.broadcast %8 : vector<1x128xf32> to vector<32x128xf32>
    %19 = arith.mulf %17, %18 : vector<32x128xf32>
    %c0_8 = arith.constant 0 : index
    %c0_9 = arith.constant 0 : index
    %20 = vector.load %arg5[%c0_8, %c0_9] : memref<32x128xf32, #tpu.memory_space<vmem>>, vector<32x128xf32>
    %21 = vector.broadcast %8 : vector<1x128xf32> to vector<32x128xf32>
    %22 = arith.mulf %20, %21 : vector<32x128xf32>
    %c0_10 = arith.constant 0 : index
    %c0_11 = arith.constant 0 : index
    %23 = vector.load %arg6[%c0_10, %c0_11] : memref<1x128xf32, #tpu.memory_space<vmem>>, vector<1x128xf32>
    %24 = arith.mulf %23, %8 : vector<1x128xf32>
    %c0_12 = arith.constant 0 : index
    %c0_13 = arith.constant 0 : index
    %25 = vector.load %arg0[%c0_12, %c0_13] : memref<64x8xf32, #tpu.memory_space<vmem>>, vector<64x8xf32>
    %cst_14 = arith.constant dense<0.000000e+00> : vector<64x128xf32>
    %26 = tpu.matmul %25, %11, %cst_14 {dimension_numbers = #tpu.dot_dimension_numbers<[1], [0], [0], [1], [0, 0, 1, 1], [], []>} : vector<64x8xf32>, vector<8x128xf32>, vector<64x128xf32> -> vector<64x128xf32>
    %27 = vector.broadcast %16 : vector<1x128xf32> to vector<64x128xf32>
    %28 = arith.addf %26, %27 : vector<64x128xf32>
    %cst_15 = arith.constant 0.000000e+00 : f32
    %29 = vector.broadcast %cst_15 : f32 to vector<8x32xf32>
    %cst_16 = arith.constant 0.000000e+00 : f32
    %30 = vector.broadcast %cst_16 : f32 to vector<8x32xf32>
    %cst_17 = arith.constant 0.000000e+00 : f32
    %31 = vector.broadcast %cst_17 : f32 to vector<8x32xf32>
    %cst_18 = arith.constant 0.000000e+00 : f32
    %32 = vector.broadcast %cst_18 : f32 to vector<8x32xf32>
    %33 = vector.extract_strided_slice %28 {offsets = [0, 0], sizes = [8, 128], strides = [1, 1]} : vector<64x128xf32> to vector<8x128xf32>
    %cst_19 = arith.constant dense<0.000000e+00> : vector<8x128xf32>
    %34 = tpu.matmul %29, %14, %cst_19 {dimension_numbers = #tpu.dot_dimension_numbers<[1], [0], [0], [1], [0, 0, 1, 1], [], []>} : vector<8x32xf32>, vector<32x128xf32>, vector<8x128xf32> -> vector<8x128xf32>
    %35 = arith.addf %33, %34 : vector<8x128xf32>
    %36 = arith.negf %35 : vector<8x128xf32>
    %37 = math.exp %36 : vector<8x128xf32>
    %cst_20 = arith.constant 1.000000e+00 : f32
    %38 = vector.broadcast %cst_20 : f32 to vector<8x128xf32>
    %39 = arith.addf %38, %37 : vector<8x128xf32>
    %40 = arith.divf %38, %39 : vector<8x128xf32>
    %41 = vector.extract_strided_slice %40 {offsets = [0, 0], sizes = [8, 32], strides = [1, 1]} : vector<8x128xf32> to vector<8x32xf32>
    %42 = vector.extract_strided_slice %40 {offsets = [0, 32], sizes = [8, 32], strides = [1, 1]} : vector<8x128xf32> to vector<8x32xf32>
    %43 = vector.extract_strided_slice %40 {offsets = [0, 64], sizes = [8, 32], strides = [1, 1]} : vector<8x128xf32> to vector<8x32xf32>
    %cst_21 = arith.constant 2.000000e+00 : f32
    %44 = vector.broadcast %cst_21 : f32 to vector<8x32xf32>
    %45 = arith.mulf %44, %43 : vector<8x32xf32>
    %cst_22 = arith.constant 1.000000e+00 : f32
    %46 = vector.broadcast %cst_22 : f32 to vector<8x32xf32>
    %47 = arith.subf %45, %46 : vector<8x32xf32>
    %48 = vector.extract_strided_slice %40 {offsets = [0, 96], sizes = [8, 32], strides = [1, 1]} : vector<8x128xf32> to vector<8x32xf32>
    %49 = arith.mulf %42, %31 : vector<8x32xf32>
    %50 = arith.mulf %41, %47 : vector<8x32xf32>
    %51 = arith.addf %49, %50 : vector<8x32xf32>
    %52 = math.tanh %51 : vector<8x32xf32>
    %53 = arith.mulf %48, %52 : vector<8x32xf32>
    %cst_23 = arith.constant dense<0.000000e+00> : vector<8x128xf32>
    %54 = tpu.matmul %53, %19, %cst_23 {dimension_numbers = #tpu.dot_dimension_numbers<[1], [0], [0], [1], [0, 0, 1, 1], [], []>} : vector<8x32xf32>, vector<32x128xf32>, vector<8x128xf32> -> vector<8x128xf32>
    %cst_24 = arith.constant dense<0.000000e+00> : vector<8x128xf32>
    %55 = tpu.matmul %30, %22, %cst_24 {dimension_numbers = #tpu.dot_dimension_numbers<[1], [0], [0], [1], [0, 0, 1, 1], [], []>} : vector<8x32xf32>, vector<32x128xf32>, vector<8x128xf32> -> vector<8x128xf32>
    %56 = arith.addf %54, %55 : vector<8x128xf32>
    %57 = vector.broadcast %24 : vector<1x128xf32> to vector<8x128xf32>
    %58 = arith.addf %56, %57 : vector<8x128xf32>
    %59 = arith.negf %58 : vector<8x128xf32>
    %60 = math.exp %59 : vector<8x128xf32>
    %cst_25 = arith.constant 1.000000e+00 : f32
    %61 = vector.broadcast %cst_25 : f32 to vector<8x128xf32>
    %62 = arith.addf %61, %60 : vector<8x128xf32>
    %63 = arith.divf %61, %62 : vector<8x128xf32>
    %64 = vector.extract_strided_slice %63 {offsets = [0, 0], sizes = [8, 32], strides = [1, 1]} : vector<8x128xf32> to vector<8x32xf32>
    %65 = vector.extract_strided_slice %63 {offsets = [0, 32], sizes = [8, 32], strides = [1, 1]} : vector<8x128xf32> to vector<8x32xf32>
    %66 = vector.extract_strided_slice %63 {offsets = [0, 64], sizes = [8, 32], strides = [1, 1]} : vector<8x128xf32> to vector<8x32xf32>
    %cst_26 = arith.constant 2.000000e+00 : f32
    %67 = vector.broadcast %cst_26 : f32 to vector<8x32xf32>
    %68 = arith.mulf %67, %66 : vector<8x32xf32>
    %cst_27 = arith.constant 1.000000e+00 : f32
    %69 = vector.broadcast %cst_27 : f32 to vector<8x32xf32>
    %70 = arith.subf %68, %69 : vector<8x32xf32>
    %71 = vector.extract_strided_slice %63 {offsets = [0, 96], sizes = [8, 32], strides = [1, 1]} : vector<8x128xf32> to vector<8x32xf32>
    %72 = arith.mulf %65, %32 : vector<8x32xf32>
    %73 = arith.mulf %64, %70 : vector<8x32xf32>
    %74 = arith.addf %72, %73 : vector<8x32xf32>
    %75 = math.tanh %74 : vector<8x32xf32>
    %76 = arith.mulf %71, %75 : vector<8x32xf32>
    %77 = vector.extract_strided_slice %28 {offsets = [8, 0], sizes = [8, 128], strides = [1, 1]} : vector<64x128xf32> to vector<8x128xf32>
    %cst_28 = arith.constant dense<0.000000e+00> : vector<8x128xf32>
    %78 = tpu.matmul %53, %14, %cst_28 {dimension_numbers = #tpu.dot_dimension_numbers<[1], [0], [0], [1], [0, 0, 1, 1], [], []>} : vector<8x32xf32>, vector<32x128xf32>, vector<8x128xf32> -> vector<8x128xf32>
    %79 = arith.addf %77, %78 : vector<8x128xf32>
    %80 = arith.negf %79 : vector<8x128xf32>
    %81 = math.exp %80 : vector<8x128xf32>
    %cst_29 = arith.constant 1.000000e+00 : f32
    %82 = vector.broadcast %cst_29 : f32 to vector<8x128xf32>
    %83 = arith.addf %82, %81 : vector<8x128xf32>
    %84 = arith.divf %82, %83 : vector<8x128xf32>
    %85 = vector.extract_strided_slice %84 {offsets = [0, 0], sizes = [8, 32], strides = [1, 1]} : vector<8x128xf32> to vector<8x32xf32>
    %86 = vector.extract_strided_slice %84 {offsets = [0, 32], sizes = [8, 32], strides = [1, 1]} : vector<8x128xf32> to vector<8x32xf32>
    %87 = vector.extract_strided_slice %84 {offsets = [0, 64], sizes = [8, 32], strides = [1, 1]} : vector<8x128xf32> to vector<8x32xf32>
    %cst_30 = arith.constant 2.000000e+00 : f32
    %88 = vector.broadcast %cst_30 : f32 to vector<8x32xf32>
    %89 = arith.mulf %88, %87 : vector<8x32xf32>
    %cst_31 = arith.constant 1.000000e+00 : f32
    %90 = vector.broadcast %cst_31 : f32 to vector<8x32xf32>
    %91 = arith.subf %89, %90 : vector<8x32xf32>
    %92 = vector.extract_strided_slice %84 {offsets = [0, 96], sizes = [8, 32], strides = [1, 1]} : vector<8x128xf32> to vector<8x32xf32>
    %93 = arith.mulf %86, %51 : vector<8x32xf32>
    %94 = arith.mulf %85, %91 : vector<8x32xf32>
    %95 = arith.addf %93, %94 : vector<8x32xf32>
    %96 = math.tanh %95 : vector<8x32xf32>
    %97 = arith.mulf %92, %96 : vector<8x32xf32>
    %cst_32 = arith.constant dense<0.000000e+00> : vector<8x128xf32>
    %98 = tpu.matmul %97, %19, %cst_32 {dimension_numbers = #tpu.dot_dimension_numbers<[1], [0], [0], [1], [0, 0, 1, 1], [], []>} : vector<8x32xf32>, vector<32x128xf32>, vector<8x128xf32> -> vector<8x128xf32>
    %cst_33 = arith.constant dense<0.000000e+00> : vector<8x128xf32>
    %99 = tpu.matmul %76, %22, %cst_33 {dimension_numbers = #tpu.dot_dimension_numbers<[1], [0], [0], [1], [0, 0, 1, 1], [], []>} : vector<8x32xf32>, vector<32x128xf32>, vector<8x128xf32> -> vector<8x128xf32>
    %100 = arith.addf %98, %99 : vector<8x128xf32>
    %101 = vector.broadcast %24 : vector<1x128xf32> to vector<8x128xf32>
    %102 = arith.addf %100, %101 : vector<8x128xf32>
    %103 = arith.negf %102 : vector<8x128xf32>
    %104 = math.exp %103 : vector<8x128xf32>
    %cst_34 = arith.constant 1.000000e+00 : f32
    %105 = vector.broadcast %cst_34 : f32 to vector<8x128xf32>
    %106 = arith.addf %105, %104 : vector<8x128xf32>
    %107 = arith.divf %105, %106 : vector<8x128xf32>
    %108 = vector.extract_strided_slice %107 {offsets = [0, 0], sizes = [8, 32], strides = [1, 1]} : vector<8x128xf32> to vector<8x32xf32>
    %109 = vector.extract_strided_slice %107 {offsets = [0, 32], sizes = [8, 32], strides = [1, 1]} : vector<8x128xf32> to vector<8x32xf32>
    %110 = vector.extract_strided_slice %107 {offsets = [0, 64], sizes = [8, 32], strides = [1, 1]} : vector<8x128xf32> to vector<8x32xf32>
    %cst_35 = arith.constant 2.000000e+00 : f32
    %111 = vector.broadcast %cst_35 : f32 to vector<8x32xf32>
    %112 = arith.mulf %111, %110 : vector<8x32xf32>
    %cst_36 = arith.constant 1.000000e+00 : f32
    %113 = vector.broadcast %cst_36 : f32 to vector<8x32xf32>
    %114 = arith.subf %112, %113 : vector<8x32xf32>
    %115 = vector.extract_strided_slice %107 {offsets = [0, 96], sizes = [8, 32], strides = [1, 1]} : vector<8x128xf32> to vector<8x32xf32>
    %116 = arith.mulf %109, %74 : vector<8x32xf32>
    %117 = arith.mulf %108, %114 : vector<8x32xf32>
    %118 = arith.addf %116, %117 : vector<8x32xf32>
    %119 = math.tanh %118 : vector<8x32xf32>
    %120 = arith.mulf %115, %119 : vector<8x32xf32>
    %121 = vector.extract_strided_slice %28 {offsets = [16, 0], sizes = [8, 128], strides = [1, 1]} : vector<64x128xf32> to vector<8x128xf32>
    %cst_37 = arith.constant dense<0.000000e+00> : vector<8x128xf32>
    %122 = tpu.matmul %97, %14, %cst_37 {dimension_numbers = #tpu.dot_dimension_numbers<[1], [0], [0], [1], [0, 0, 1, 1], [], []>} : vector<8x32xf32>, vector<32x128xf32>, vector<8x128xf32> -> vector<8x128xf32>
    %123 = arith.addf %121, %122 : vector<8x128xf32>
    %124 = arith.negf %123 : vector<8x128xf32>
    %125 = math.exp %124 : vector<8x128xf32>
    %cst_38 = arith.constant 1.000000e+00 : f32
    %126 = vector.broadcast %cst_38 : f32 to vector<8x128xf32>
    %127 = arith.addf %126, %125 : vector<8x128xf32>
    %128 = arith.divf %126, %127 : vector<8x128xf32>
    %129 = vector.extract_strided_slice %128 {offsets = [0, 0], sizes = [8, 32], strides = [1, 1]} : vector<8x128xf32> to vector<8x32xf32>
    %130 = vector.extract_strided_slice %128 {offsets = [0, 32], sizes = [8, 32], strides = [1, 1]} : vector<8x128xf32> to vector<8x32xf32>
    %131 = vector.extract_strided_slice %128 {offsets = [0, 64], sizes = [8, 32], strides = [1, 1]} : vector<8x128xf32> to vector<8x32xf32>
    %cst_39 = arith.constant 2.000000e+00 : f32
    %132 = vector.broadcast %cst_39 : f32 to vector<8x32xf32>
    %133 = arith.mulf %132, %131 : vector<8x32xf32>
    %cst_40 = arith.constant 1.000000e+00 : f32
    %134 = vector.broadcast %cst_40 : f32 to vector<8x32xf32>
    %135 = arith.subf %133, %134 : vector<8x32xf32>
    %136 = vector.extract_strided_slice %128 {offsets = [0, 96], sizes = [8, 32], strides = [1, 1]} : vector<8x128xf32> to vector<8x32xf32>
    %137 = arith.mulf %130, %95 : vector<8x32xf32>
    %138 = arith.mulf %129, %135 : vector<8x32xf32>
    %139 = arith.addf %137, %138 : vector<8x32xf32>
    %140 = math.tanh %139 : vector<8x32xf32>
    %141 = arith.mulf %136, %140 : vector<8x32xf32>
    %cst_41 = arith.constant dense<0.000000e+00> : vector<8x128xf32>
    %142 = tpu.matmul %141, %19, %cst_41 {dimension_numbers = #tpu.dot_dimension_numbers<[1], [0], [0], [1], [0, 0, 1, 1], [], []>} : vector<8x32xf32>, vector<32x128xf32>, vector<8x128xf32> -> vector<8x128xf32>
    %cst_42 = arith.constant dense<0.000000e+00> : vector<8x128xf32>
    %143 = tpu.matmul %120, %22, %cst_42 {dimension_numbers = #tpu.dot_dimension_numbers<[1], [0], [0], [1], [0, 0, 1, 1], [], []>} : vector<8x32xf32>, vector<32x128xf32>, vector<8x128xf32> -> vector<8x128xf32>
    %144 = arith.addf %142, %143 : vector<8x128xf32>
    %145 = vector.broadcast %24 : vector<1x128xf32> to vector<8x128xf32>
    %146 = arith.addf %144, %145 : vector<8x128xf32>
    %147 = arith.negf %146 : vector<8x128xf32>
    %148 = math.exp %147 : vector<8x128xf32>
    %cst_43 = arith.constant 1.000000e+00 : f32
    %149 = vector.broadcast %cst_43 : f32 to vector<8x128xf32>
    %150 = arith.addf %149, %148 : vector<8x128xf32>
    %151 = arith.divf %149, %150 : vector<8x128xf32>
    %152 = vector.extract_strided_slice %151 {offsets = [0, 0], sizes = [8, 32], strides = [1, 1]} : vector<8x128xf32> to vector<8x32xf32>
    %153 = vector.extract_strided_slice %151 {offsets = [0, 32], sizes = [8, 32], strides = [1, 1]} : vector<8x128xf32> to vector<8x32xf32>
    %154 = vector.extract_strided_slice %151 {offsets = [0, 64], sizes = [8, 32], strides = [1, 1]} : vector<8x128xf32> to vector<8x32xf32>
    %cst_44 = arith.constant 2.000000e+00 : f32
    %155 = vector.broadcast %cst_44 : f32 to vector<8x32xf32>
    %156 = arith.mulf %155, %154 : vector<8x32xf32>
    %cst_45 = arith.constant 1.000000e+00 : f32
    %157 = vector.broadcast %cst_45 : f32 to vector<8x32xf32>
    %158 = arith.subf %156, %157 : vector<8x32xf32>
    %159 = vector.extract_strided_slice %151 {offsets = [0, 96], sizes = [8, 32], strides = [1, 1]} : vector<8x128xf32> to vector<8x32xf32>
    %160 = arith.mulf %153, %118 : vector<8x32xf32>
    %161 = arith.mulf %152, %158 : vector<8x32xf32>
    %162 = arith.addf %160, %161 : vector<8x32xf32>
    %163 = math.tanh %162 : vector<8x32xf32>
    %164 = arith.mulf %159, %163 : vector<8x32xf32>
    %165 = vector.extract_strided_slice %28 {offsets = [24, 0], sizes = [8, 128], strides = [1, 1]} : vector<64x128xf32> to vector<8x128xf32>
    %cst_46 = arith.constant dense<0.000000e+00> : vector<8x128xf32>
    %166 = tpu.matmul %141, %14, %cst_46 {dimension_numbers = #tpu.dot_dimension_numbers<[1], [0], [0], [1], [0, 0, 1, 1], [], []>} : vector<8x32xf32>, vector<32x128xf32>, vector<8x128xf32> -> vector<8x128xf32>
    %167 = arith.addf %165, %166 : vector<8x128xf32>
    %168 = arith.negf %167 : vector<8x128xf32>
    %169 = math.exp %168 : vector<8x128xf32>
    %cst_47 = arith.constant 1.000000e+00 : f32
    %170 = vector.broadcast %cst_47 : f32 to vector<8x128xf32>
    %171 = arith.addf %170, %169 : vector<8x128xf32>
    %172 = arith.divf %170, %171 : vector<8x128xf32>
    %173 = vector.extract_strided_slice %172 {offsets = [0, 0], sizes = [8, 32], strides = [1, 1]} : vector<8x128xf32> to vector<8x32xf32>
    %174 = vector.extract_strided_slice %172 {offsets = [0, 32], sizes = [8, 32], strides = [1, 1]} : vector<8x128xf32> to vector<8x32xf32>
    %175 = vector.extract_strided_slice %172 {offsets = [0, 64], sizes = [8, 32], strides = [1, 1]} : vector<8x128xf32> to vector<8x32xf32>
    %cst_48 = arith.constant 2.000000e+00 : f32
    %176 = vector.broadcast %cst_48 : f32 to vector<8x32xf32>
    %177 = arith.mulf %176, %175 : vector<8x32xf32>
    %cst_49 = arith.constant 1.000000e+00 : f32
    %178 = vector.broadcast %cst_49 : f32 to vector<8x32xf32>
    %179 = arith.subf %177, %178 : vector<8x32xf32>
    %180 = vector.extract_strided_slice %172 {offsets = [0, 96], sizes = [8, 32], strides = [1, 1]} : vector<8x128xf32> to vector<8x32xf32>
    %181 = arith.mulf %174, %139 : vector<8x32xf32>
    %182 = arith.mulf %173, %179 : vector<8x32xf32>
    %183 = arith.addf %181, %182 : vector<8x32xf32>
    %184 = math.tanh %183 : vector<8x32xf32>
    %185 = arith.mulf %180, %184 : vector<8x32xf32>
    %cst_50 = arith.constant dense<0.000000e+00> : vector<8x128xf32>
    %186 = tpu.matmul %185, %19, %cst_50 {dimension_numbers = #tpu.dot_dimension_numbers<[1], [0], [0], [1], [0, 0, 1, 1], [], []>} : vector<8x32xf32>, vector<32x128xf32>, vector<8x128xf32> -> vector<8x128xf32>
    %cst_51 = arith.constant dense<0.000000e+00> : vector<8x128xf32>
    %187 = tpu.matmul %164, %22, %cst_51 {dimension_numbers = #tpu.dot_dimension_numbers<[1], [0], [0], [1], [0, 0, 1, 1], [], []>} : vector<8x32xf32>, vector<32x128xf32>, vector<8x128xf32> -> vector<8x128xf32>
    %188 = arith.addf %186, %187 : vector<8x128xf32>
    %189 = vector.broadcast %24 : vector<1x128xf32> to vector<8x128xf32>
    %190 = arith.addf %188, %189 : vector<8x128xf32>
    %191 = arith.negf %190 : vector<8x128xf32>
    %192 = math.exp %191 : vector<8x128xf32>
    %cst_52 = arith.constant 1.000000e+00 : f32
    %193 = vector.broadcast %cst_52 : f32 to vector<8x128xf32>
    %194 = arith.addf %193, %192 : vector<8x128xf32>
    %195 = arith.divf %193, %194 : vector<8x128xf32>
    %196 = vector.extract_strided_slice %195 {offsets = [0, 0], sizes = [8, 32], strides = [1, 1]} : vector<8x128xf32> to vector<8x32xf32>
    %197 = vector.extract_strided_slice %195 {offsets = [0, 32], sizes = [8, 32], strides = [1, 1]} : vector<8x128xf32> to vector<8x32xf32>
    %198 = vector.extract_strided_slice %195 {offsets = [0, 64], sizes = [8, 32], strides = [1, 1]} : vector<8x128xf32> to vector<8x32xf32>
    %cst_53 = arith.constant 2.000000e+00 : f32
    %199 = vector.broadcast %cst_53 : f32 to vector<8x32xf32>
    %200 = arith.mulf %199, %198 : vector<8x32xf32>
    %cst_54 = arith.constant 1.000000e+00 : f32
    %201 = vector.broadcast %cst_54 : f32 to vector<8x32xf32>
    %202 = arith.subf %200, %201 : vector<8x32xf32>
    %203 = vector.extract_strided_slice %195 {offsets = [0, 96], sizes = [8, 32], strides = [1, 1]} : vector<8x128xf32> to vector<8x32xf32>
    %204 = arith.mulf %197, %162 : vector<8x32xf32>
    %205 = arith.mulf %196, %202 : vector<8x32xf32>
    %206 = arith.addf %204, %205 : vector<8x32xf32>
    %207 = math.tanh %206 : vector<8x32xf32>
    %208 = arith.mulf %203, %207 : vector<8x32xf32>
    %209 = vector.extract_strided_slice %28 {offsets = [32, 0], sizes = [8, 128], strides = [1, 1]} : vector<64x128xf32> to vector<8x128xf32>
    %cst_55 = arith.constant dense<0.000000e+00> : vector<8x128xf32>
    %210 = tpu.matmul %185, %14, %cst_55 {dimension_numbers = #tpu.dot_dimension_numbers<[1], [0], [0], [1], [0, 0, 1, 1], [], []>} : vector<8x32xf32>, vector<32x128xf32>, vector<8x128xf32> -> vector<8x128xf32>
    %211 = arith.addf %209, %210 : vector<8x128xf32>
    %212 = arith.negf %211 : vector<8x128xf32>
    %213 = math.exp %212 : vector<8x128xf32>
    %cst_56 = arith.constant 1.000000e+00 : f32
    %214 = vector.broadcast %cst_56 : f32 to vector<8x128xf32>
    %215 = arith.addf %214, %213 : vector<8x128xf32>
    %216 = arith.divf %214, %215 : vector<8x128xf32>
    %217 = vector.extract_strided_slice %216 {offsets = [0, 0], sizes = [8, 32], strides = [1, 1]} : vector<8x128xf32> to vector<8x32xf32>
    %218 = vector.extract_strided_slice %216 {offsets = [0, 32], sizes = [8, 32], strides = [1, 1]} : vector<8x128xf32> to vector<8x32xf32>
    %219 = vector.extract_strided_slice %216 {offsets = [0, 64], sizes = [8, 32], strides = [1, 1]} : vector<8x128xf32> to vector<8x32xf32>
    %cst_57 = arith.constant 2.000000e+00 : f32
    %220 = vector.broadcast %cst_57 : f32 to vector<8x32xf32>
    %221 = arith.mulf %220, %219 : vector<8x32xf32>
    %cst_58 = arith.constant 1.000000e+00 : f32
    %222 = vector.broadcast %cst_58 : f32 to vector<8x32xf32>
    %223 = arith.subf %221, %222 : vector<8x32xf32>
    %224 = vector.extract_strided_slice %216 {offsets = [0, 96], sizes = [8, 32], strides = [1, 1]} : vector<8x128xf32> to vector<8x32xf32>
    %225 = arith.mulf %218, %183 : vector<8x32xf32>
    %226 = arith.mulf %217, %223 : vector<8x32xf32>
    %227 = arith.addf %225, %226 : vector<8x32xf32>
    %228 = math.tanh %227 : vector<8x32xf32>
    %229 = arith.mulf %224, %228 : vector<8x32xf32>
    %cst_59 = arith.constant dense<0.000000e+00> : vector<8x128xf32>
    %230 = tpu.matmul %229, %19, %cst_59 {dimension_numbers = #tpu.dot_dimension_numbers<[1], [0], [0], [1], [0, 0, 1, 1], [], []>} : vector<8x32xf32>, vector<32x128xf32>, vector<8x128xf32> -> vector<8x128xf32>
    %cst_60 = arith.constant dense<0.000000e+00> : vector<8x128xf32>
    %231 = tpu.matmul %208, %22, %cst_60 {dimension_numbers = #tpu.dot_dimension_numbers<[1], [0], [0], [1], [0, 0, 1, 1], [], []>} : vector<8x32xf32>, vector<32x128xf32>, vector<8x128xf32> -> vector<8x128xf32>
    %232 = arith.addf %230, %231 : vector<8x128xf32>
    %233 = vector.broadcast %24 : vector<1x128xf32> to vector<8x128xf32>
    %234 = arith.addf %232, %233 : vector<8x128xf32>
    %235 = arith.negf %234 : vector<8x128xf32>
    %236 = math.exp %235 : vector<8x128xf32>
    %cst_61 = arith.constant 1.000000e+00 : f32
    %237 = vector.broadcast %cst_61 : f32 to vector<8x128xf32>
    %238 = arith.addf %237, %236 : vector<8x128xf32>
    %239 = arith.divf %237, %238 : vector<8x128xf32>
    %240 = vector.extract_strided_slice %239 {offsets = [0, 0], sizes = [8, 32], strides = [1, 1]} : vector<8x128xf32> to vector<8x32xf32>
    %241 = vector.extract_strided_slice %239 {offsets = [0, 32], sizes = [8, 32], strides = [1, 1]} : vector<8x128xf32> to vector<8x32xf32>
    %242 = vector.extract_strided_slice %239 {offsets = [0, 64], sizes = [8, 32], strides = [1, 1]} : vector<8x128xf32> to vector<8x32xf32>
    %cst_62 = arith.constant 2.000000e+00 : f32
    %243 = vector.broadcast %cst_62 : f32 to vector<8x32xf32>
    %244 = arith.mulf %243, %242 : vector<8x32xf32>
    %cst_63 = arith.constant 1.000000e+00 : f32
    %245 = vector.broadcast %cst_63 : f32 to vector<8x32xf32>
    %246 = arith.subf %244, %245 : vector<8x32xf32>
    %247 = vector.extract_strided_slice %239 {offsets = [0, 96], sizes = [8, 32], strides = [1, 1]} : vector<8x128xf32> to vector<8x32xf32>
    %248 = arith.mulf %241, %206 : vector<8x32xf32>
    %249 = arith.mulf %240, %246 : vector<8x32xf32>
    %250 = arith.addf %248, %249 : vector<8x32xf32>
    %251 = math.tanh %250 : vector<8x32xf32>
    %252 = arith.mulf %247, %251 : vector<8x32xf32>
    %253 = vector.extract_strided_slice %28 {offsets = [40, 0], sizes = [8, 128], strides = [1, 1]} : vector<64x128xf32> to vector<8x128xf32>
    %cst_64 = arith.constant dense<0.000000e+00> : vector<8x128xf32>
    %254 = tpu.matmul %229, %14, %cst_64 {dimension_numbers = #tpu.dot_dimension_numbers<[1], [0], [0], [1], [0, 0, 1, 1], [], []>} : vector<8x32xf32>, vector<32x128xf32>, vector<8x128xf32> -> vector<8x128xf32>
    %255 = arith.addf %253, %254 : vector<8x128xf32>
    %256 = arith.negf %255 : vector<8x128xf32>
    %257 = math.exp %256 : vector<8x128xf32>
    %cst_65 = arith.constant 1.000000e+00 : f32
    %258 = vector.broadcast %cst_65 : f32 to vector<8x128xf32>
    %259 = arith.addf %258, %257 : vector<8x128xf32>
    %260 = arith.divf %258, %259 : vector<8x128xf32>
    %261 = vector.extract_strided_slice %260 {offsets = [0, 0], sizes = [8, 32], strides = [1, 1]} : vector<8x128xf32> to vector<8x32xf32>
    %262 = vector.extract_strided_slice %260 {offsets = [0, 32], sizes = [8, 32], strides = [1, 1]} : vector<8x128xf32> to vector<8x32xf32>
    %263 = vector.extract_strided_slice %260 {offsets = [0, 64], sizes = [8, 32], strides = [1, 1]} : vector<8x128xf32> to vector<8x32xf32>
    %cst_66 = arith.constant 2.000000e+00 : f32
    %264 = vector.broadcast %cst_66 : f32 to vector<8x32xf32>
    %265 = arith.mulf %264, %263 : vector<8x32xf32>
    %cst_67 = arith.constant 1.000000e+00 : f32
    %266 = vector.broadcast %cst_67 : f32 to vector<8x32xf32>
    %267 = arith.subf %265, %266 : vector<8x32xf32>
    %268 = vector.extract_strided_slice %260 {offsets = [0, 96], sizes = [8, 32], strides = [1, 1]} : vector<8x128xf32> to vector<8x32xf32>
    %269 = arith.mulf %262, %227 : vector<8x32xf32>
    %270 = arith.mulf %261, %267 : vector<8x32xf32>
    %271 = arith.addf %269, %270 : vector<8x32xf32>
    %272 = math.tanh %271 : vector<8x32xf32>
    %273 = arith.mulf %268, %272 : vector<8x32xf32>
    %cst_68 = arith.constant dense<0.000000e+00> : vector<8x128xf32>
    %274 = tpu.matmul %273, %19, %cst_68 {dimension_numbers = #tpu.dot_dimension_numbers<[1], [0], [0], [1], [0, 0, 1, 1], [], []>} : vector<8x32xf32>, vector<32x128xf32>, vector<8x128xf32> -> vector<8x128xf32>
    %cst_69 = arith.constant dense<0.000000e+00> : vector<8x128xf32>
    %275 = tpu.matmul %252, %22, %cst_69 {dimension_numbers = #tpu.dot_dimension_numbers<[1], [0], [0], [1], [0, 0, 1, 1], [], []>} : vector<8x32xf32>, vector<32x128xf32>, vector<8x128xf32> -> vector<8x128xf32>
    %276 = arith.addf %274, %275 : vector<8x128xf32>
    %277 = vector.broadcast %24 : vector<1x128xf32> to vector<8x128xf32>
    %278 = arith.addf %276, %277 : vector<8x128xf32>
    %279 = arith.negf %278 : vector<8x128xf32>
    %280 = math.exp %279 : vector<8x128xf32>
    %cst_70 = arith.constant 1.000000e+00 : f32
    %281 = vector.broadcast %cst_70 : f32 to vector<8x128xf32>
    %282 = arith.addf %281, %280 : vector<8x128xf32>
    %283 = arith.divf %281, %282 : vector<8x128xf32>
    %284 = vector.extract_strided_slice %283 {offsets = [0, 0], sizes = [8, 32], strides = [1, 1]} : vector<8x128xf32> to vector<8x32xf32>
    %285 = vector.extract_strided_slice %283 {offsets = [0, 32], sizes = [8, 32], strides = [1, 1]} : vector<8x128xf32> to vector<8x32xf32>
    %286 = vector.extract_strided_slice %283 {offsets = [0, 64], sizes = [8, 32], strides = [1, 1]} : vector<8x128xf32> to vector<8x32xf32>
    %cst_71 = arith.constant 2.000000e+00 : f32
    %287 = vector.broadcast %cst_71 : f32 to vector<8x32xf32>
    %288 = arith.mulf %287, %286 : vector<8x32xf32>
    %cst_72 = arith.constant 1.000000e+00 : f32
    %289 = vector.broadcast %cst_72 : f32 to vector<8x32xf32>
    %290 = arith.subf %288, %289 : vector<8x32xf32>
    %291 = vector.extract_strided_slice %283 {offsets = [0, 96], sizes = [8, 32], strides = [1, 1]} : vector<8x128xf32> to vector<8x32xf32>
    %292 = arith.mulf %285, %250 : vector<8x32xf32>
    %293 = arith.mulf %284, %290 : vector<8x32xf32>
    %294 = arith.addf %292, %293 : vector<8x32xf32>
    %295 = math.tanh %294 : vector<8x32xf32>
    %296 = arith.mulf %291, %295 : vector<8x32xf32>
    %297 = vector.extract_strided_slice %28 {offsets = [48, 0], sizes = [8, 128], strides = [1, 1]} : vector<64x128xf32> to vector<8x128xf32>
    %cst_73 = arith.constant dense<0.000000e+00> : vector<8x128xf32>
    %298 = tpu.matmul %273, %14, %cst_73 {dimension_numbers = #tpu.dot_dimension_numbers<[1], [0], [0], [1], [0, 0, 1, 1], [], []>} : vector<8x32xf32>, vector<32x128xf32>, vector<8x128xf32> -> vector<8x128xf32>
    %299 = arith.addf %297, %298 : vector<8x128xf32>
    %300 = arith.negf %299 : vector<8x128xf32>
    %301 = math.exp %300 : vector<8x128xf32>
    %cst_74 = arith.constant 1.000000e+00 : f32
    %302 = vector.broadcast %cst_74 : f32 to vector<8x128xf32>
    %303 = arith.addf %302, %301 : vector<8x128xf32>
    %304 = arith.divf %302, %303 : vector<8x128xf32>
    %305 = vector.extract_strided_slice %304 {offsets = [0, 0], sizes = [8, 32], strides = [1, 1]} : vector<8x128xf32> to vector<8x32xf32>
    %306 = vector.extract_strided_slice %304 {offsets = [0, 32], sizes = [8, 32], strides = [1, 1]} : vector<8x128xf32> to vector<8x32xf32>
    %307 = vector.extract_strided_slice %304 {offsets = [0, 64], sizes = [8, 32], strides = [1, 1]} : vector<8x128xf32> to vector<8x32xf32>
    %cst_75 = arith.constant 2.000000e+00 : f32
    %308 = vector.broadcast %cst_75 : f32 to vector<8x32xf32>
    %309 = arith.mulf %308, %307 : vector<8x32xf32>
    %cst_76 = arith.constant 1.000000e+00 : f32
    %310 = vector.broadcast %cst_76 : f32 to vector<8x32xf32>
    %311 = arith.subf %309, %310 : vector<8x32xf32>
    %312 = vector.extract_strided_slice %304 {offsets = [0, 96], sizes = [8, 32], strides = [1, 1]} : vector<8x128xf32> to vector<8x32xf32>
    %313 = arith.mulf %306, %271 : vector<8x32xf32>
    %314 = arith.mulf %305, %311 : vector<8x32xf32>
    %315 = arith.addf %313, %314 : vector<8x32xf32>
    %316 = math.tanh %315 : vector<8x32xf32>
    %317 = arith.mulf %312, %316 : vector<8x32xf32>
    %cst_77 = arith.constant dense<0.000000e+00> : vector<8x128xf32>
    %318 = tpu.matmul %317, %19, %cst_77 {dimension_numbers = #tpu.dot_dimension_numbers<[1], [0], [0], [1], [0, 0, 1, 1], [], []>} : vector<8x32xf32>, vector<32x128xf32>, vector<8x128xf32> -> vector<8x128xf32>
    %cst_78 = arith.constant dense<0.000000e+00> : vector<8x128xf32>
    %319 = tpu.matmul %296, %22, %cst_78 {dimension_numbers = #tpu.dot_dimension_numbers<[1], [0], [0], [1], [0, 0, 1, 1], [], []>} : vector<8x32xf32>, vector<32x128xf32>, vector<8x128xf32> -> vector<8x128xf32>
    %320 = arith.addf %318, %319 : vector<8x128xf32>
    %321 = vector.broadcast %24 : vector<1x128xf32> to vector<8x128xf32>
    %322 = arith.addf %320, %321 : vector<8x128xf32>
    %323 = arith.negf %322 : vector<8x128xf32>
    %324 = math.exp %323 : vector<8x128xf32>
    %cst_79 = arith.constant 1.000000e+00 : f32
    %325 = vector.broadcast %cst_79 : f32 to vector<8x128xf32>
    %326 = arith.addf %325, %324 : vector<8x128xf32>
    %327 = arith.divf %325, %326 : vector<8x128xf32>
    %328 = vector.extract_strided_slice %327 {offsets = [0, 0], sizes = [8, 32], strides = [1, 1]} : vector<8x128xf32> to vector<8x32xf32>
    %329 = vector.extract_strided_slice %327 {offsets = [0, 32], sizes = [8, 32], strides = [1, 1]} : vector<8x128xf32> to vector<8x32xf32>
    %330 = vector.extract_strided_slice %327 {offsets = [0, 64], sizes = [8, 32], strides = [1, 1]} : vector<8x128xf32> to vector<8x32xf32>
    %cst_80 = arith.constant 2.000000e+00 : f32
    %331 = vector.broadcast %cst_80 : f32 to vector<8x32xf32>
    %332 = arith.mulf %331, %330 : vector<8x32xf32>
    %cst_81 = arith.constant 1.000000e+00 : f32
    %333 = vector.broadcast %cst_81 : f32 to vector<8x32xf32>
    %334 = arith.subf %332, %333 : vector<8x32xf32>
    %335 = vector.extract_strided_slice %327 {offsets = [0, 96], sizes = [8, 32], strides = [1, 1]} : vector<8x128xf32> to vector<8x32xf32>
    %336 = arith.mulf %329, %294 : vector<8x32xf32>
    %337 = arith.mulf %328, %334 : vector<8x32xf32>
    %338 = arith.addf %336, %337 : vector<8x32xf32>
    %339 = math.tanh %338 : vector<8x32xf32>
    %340 = arith.mulf %335, %339 : vector<8x32xf32>
    %341 = tpu.concatenate %164, %340 in 0 : vector<8x32xf32>, vector<8x32xf32> -> vector<16x32xf32>
    %c0_82 = arith.constant 0 : index
    %c0_83 = arith.constant 0 : index
    %342 = vector.load %arg7[%c0_82, %c0_83] : memref<32x128xf32, #tpu.memory_space<vmem>>, vector<32x128xf32>
    %cst_84 = arith.constant dense<0.000000e+00> : vector<16x128xf32>
    %343 = tpu.matmul %341, %342, %cst_84 {dimension_numbers = #tpu.dot_dimension_numbers<[1], [0], [0], [1], [0, 0, 1, 1], [], []>} : vector<16x32xf32>, vector<32x128xf32>, vector<16x128xf32> -> vector<16x128xf32>
    %c0_85 = arith.constant 0 : index
    %c0_86 = arith.constant 0 : index
    %344 = vector.load %arg8[%c0_85, %c0_86] : memref<1x128xf32, #tpu.memory_space<vmem>>, vector<1x128xf32>
    %345 = vector.broadcast %344 : vector<1x128xf32> to vector<16x128xf32>
    %346 = arith.addf %343, %345 : vector<16x128xf32>
    %c0_87 = arith.constant 0 : index
    %c0_88 = arith.constant 0 : index
    %347 = vector.load %arg9[%c0_87, %c0_88] : memref<16x128xf32, #tpu.memory_space<vmem>>, vector<16x128xf32>
    tpu.vector_store %arg9[%c0_87, %c0_88], %346 {strides = array<i32>} : memref<16x128xf32, #tpu.memory_space<vmem>>, vector<16x128xf32>,
    return
  }
}

</mosaic_0001>

<bundles_post_ra>
// kernel: validate_lstm_forward.1
= control target key start
LH: loop header
LB: loop body
LE: loop exit
PB: predicated region body
PF: predicated region fallthrough
CT: control target
= control target key end

     0   :  { %v32_v0 = vlaneseq  ;;  %vm82_vm0 = vcmask 64512   ;;  %v2875_v1 = vmov 0.0|0.0   ;;  %vm2876_vm1 = vmmov 0   ;;  %s2880_s23 = smov 32   ;;  %s3360_s2 = inlined_call_operand.vmem [shape: f32[32,128], index: 2, kind: input, shape index: {}]   ;;  %s3361_s0 = inlined_call_operand.vmem [shape: f32[64,8], index: 0, kind: input, shape index: {}]   ;;  %s3362_s1 = inlined_call_operand.vmem [shape: f32[8,128], index: 1, kind: input, shape index: {}]   ;;  %s3363_s3 = inlined_call_operand.vmem [shape: f32[1,128], index: 3, kind: input, shape index: {}]   ;;  %s3364_s4 = inlined_call_operand.vmem [shape: f32[32,128], index: 4, kind: input, shape index: {}]   ;;  %s3365_s5 = inlined_call_operand.vmem [shape: f32[32,128], index: 5, kind: input, shape index: {}]   ;;  %s3366_s6 = inlined_call_operand.vmem [shape: f32[1,128], index: 6, kind: input, shape index: {}]   ;;  %s3367_s7 = inlined_call_operand.vmem [shape: f32[32,128], index: 7, kind: input, shape index: {}]   ;;  %s3368_s8 = inlined_call_operand.vmem [shape: f32[1,128], index: 8, kind: input, shape index: {}]   ;;  %s3369_s9 = inlined_call_operand.vmem [shape: f32[16,128], index: 9, kind: output, shape index: {}]  }
   0x1   :  { %2651 = vmatprep.subr.bf16.mxu1 %v2875_v1  ;;  %v68_v3 = vld [vmem:[%s3361_s0] sm:$0xff]  ;;  %v2877_v4 = vmov 0.0   ;;  %v41_v6 = vld [vmem:[%s3360_s2 + $0x8] sm:$0xff]  ;;  %v42_v8 = vld [vmem:[%s3360_s2 + $0x10] sm:$0xff]  ;;  %v2878_v10 = vmov 1.0   ;;  %vm211_vm5 = vcmask 261120  }
   0x2   :  { %v33_v2 = vand.u32 127, %v32_v0  ;;  %2417 = vmatprep.mubr.msk.f32.mxu1 %vm2876_vm1, %v2877_v4  ;;  %v40_v5 = vld [vmem:[%s3360_s2] sm:$0xff]  ;;  %2397 = vmatprep.mubr.msk.f32.mxu0 %vm82_vm0, %v68_v3  ;;  %v43_v9 = vld [vmem:[%s3360_s2 + $0x18] sm:$0xff]  ;;  %v69_v16 = vld [vmem:[%s3361_s0 + $0x8] sm:$0xff]  ;;  %v2976_v20 = vshrl.u32 %v32_v0, 7 }
   0x3   :  { %v38_v7 = vld [vmem:[%s3362_s1] sm:$0xff]  ;;  %v70_v42 = vld [vmem:[%s3361_s0 + $0x10] sm:$0xff]  ;;  %v71_v43 = vld [vmem:[%s3361_s0 + $0x18] sm:$0xff] }
   0x4   :  { %vm34_vm2 = vcmp.ge.s32.totalorder %v33_v2, 64  ;;  %vm35_vm3 = vcmp.lt.s32.totalorder %v33_v2, 96  ;;  %v48_v21 = vld [vmem:[%s3363_s3] sm:$0x1]  ;;  %v79_v23 = vsub.s32 0, %v2976_v20  ;;  %s2879_s3 = smov 64  }
   0x5   :  { %vm36_vm4 = vmand %vm34_vm2, %vm35_vm3  ;;  %v72_v44 = vld [vmem:[%s3361_s0 + $0x20] sm:$0xff]  ;;  %v51_v46 = vld [vmem:[%s3364_s4 + $0x8] sm:$0xff] }
   0x6   :  { %v2953_v11 = vsel %vm36_vm4, 2.0, %v2878_v10  ;;  %v50_v45 = vld [vmem:[%s3364_s4] sm:$0xff]  ;;  %v59_v50 = vld [vmem:[%s3365_s5 + $0x8] sm:$0xff]  ;;  %v60_v52 = vld [vmem:[%s3365_s5 + $0x10] sm:$0xff] }
   0x7   :  { %v44_v12 = vmul.f32 %v40_v5, %v2953_v11  ;;  %v45_v13 = vmul.f32 %v41_v6, %v2953_v11  ;;  %v39_v14 = vmul.f32 %v38_v7, %v2953_v11  ;;  %v46_v15 = vmul.f32 %v42_v8, %v2953_v11  ;;  %v58_v47 = vld [vmem:[%s3365_s5] sm:$0xff]  ;;  %v61_v53 = vld [vmem:[%s3365_s5 + $0x18] sm:$0xff]  ;;  %v52_v57 = vld [vmem:[%s3364_s4 + $0x10] sm:$0xff] }
   0x8   :  { %v47_v17 = vmul.f32 %v43_v9, %v2953_v11  ;;  %v49_v22 = vmul.f32 %v48_v21, %v2953_v11  ;;  %v54_v48 = vmul.f32 %v50_v45, %v2953_v11  ;;  %v55_v49 = vmul.f32 %v51_v46, %v2953_v11  ;;  %v53_v58 = vld [vmem:[%s3364_s4 + $0x18] sm:$0xff]  ;;  %v73_v60 = vld [vmem:[%s3361_s0 + $0x28] sm:$0xff]  ;;  %v74_v2 = vld [vmem:[%s3361_s0 + $0x30] sm:$0xff] }
   0x9   :  { %v2963_v18 = vpack.c.bf16 %v45_v13, %v44_v12  ;;  %2395 = vmatprep.subr.mxu0 %v39_v14  ;;  %v62_v51 = vmul.f32 %v58_v47, %v2953_v11  ;;  %v63_v54 = vmul.f32 %v59_v50, %v2953_v11  ;;  %v64_v55 = vmul.f32 %v60_v52, %v2953_v11  ;;  %v75_v5 = vld [vmem:[%s3361_s0 + $0x38] sm:$0xff] }
   0xa   :  { %2396 = vmatpush3.msra.mxu0 %v39_v14  ;;  %v2967_v19 = vpack.c.bf16 %v47_v17, %v46_v15  ;;  %v2985_v24 = vrot.slane %v49_v22, %v79_v23  ;;  %v65_v56 = vmul.f32 %v61_v53, %v2953_v11  ;;  %v3042_v59 = vpack.c.bf16 %v55_v49, %v54_v48  ;;  %v66_v22 = vld [vmem:[%s3366_s6] sm:$0x1] }
   0xb   :  { %2653 = vmatpush3.bf16.msra.mxu1 %v2963_v18  ;;  %2398 = vmatmul.mubr.msk.f32.vlgmr.msra.gmra.mrb[0].mxu0 %vm82_vm0, %v69_v16  ;;  %v56_v61 = vmul.f32 %v52_v57, %v2953_v11  ;;  %v57_v62 = vmul.f32 %v53_v58, %v2953_v11  ;;  %v3049_v63 = vpack.c.bf16 %v63_v54, %v62_v51 }
   0xc   :  { %2654 = vmatprep.subr.bf16.mxu1 %v2875_v1  ;;  %2663 = vmatprep.subr.bf16.mxu0 %v2875_v1  ;;  %v3058_v3 = vpack.c.bf16 %v65_v56, %v64_v55 }
   0xd   :  { %2400 = vmatprep.mubr.msk.f32.mxu0 %vm82_vm0, %v70_v42  ;;  %2665 = vmatpush3.bf16.msra.mxu0 %v3042_v59  ;;  %v3052_v0 = vpack.c.bf16 %v57_v62, %v56_v61 }
   0xe   :  { %2666 = vmatprep.subr.bf16.mxu0 %v2875_v1 }
   0xf   :  { %2656 = vmatpush3.bf16.msra.mxu1 %v2967_v19  ;;  %2401 = vmatmul.mubr.msk.f32.gmra.mrb[2].mxu0 %vm82_vm0, %v71_v43 }
  0x10   :  { %2657 = vmatprep.subr.bf16.mxu1 %v2875_v1  ;;  %2403 = vmatprep.mubr.msk.f32.mxu0 %vm82_vm0, %v72_v44 }
  0x11   :  { %2668 = vmatpush3.bf16.msra.mxu0 %v3052_v0 }
  0x12   :  { %2418 = vmatmul.mubr.f32.vlgmr.msra.gmra.mrb[0].mxu1 %v2877_v4  ;;  %2675 = vmatprep.subr.bf16.mxu0 %v2875_v1 }
  0x13   :  { %2428 = vmatprep.mubr.msk.f32.mxu1 %vm2876_vm1, %v2877_v4  ;;  %2659 = vmatpush3.bf16.msra.mxu1 %v3049_v63 }
  0x14   :  { %2404 = vmatmul.mubr.msk.f32.gmra.mrb[4].mxu0 %vm82_vm0, %v73_v60  ;;  %2660 = vmatprep.subr.bf16.mxu1 %v2875_v1 }
  0x15   :  { %2406 = vmatprep.mubr.msk.f32.mxu0 %vm82_vm0, %v74_v2 }
  0x17   :  { %2662 = vmatpush3.bf16.msra.mxu1 %v3058_v3 }
  0x18   :  { %2669 = vmatprep.subr.bf16.mxu1 %v2875_v1  ;;  %2407 = vmatmul.mubr.msk.f32.gmra.mrb[6].mxu0 %vm82_vm0, %v75_v5 }
  0x19   :  { %2439 = vmatprep.mubr.msk.f32.mxu0 %vm2876_vm1, %v2877_v4 }
  0x1a   :  { %2429 = vmatmul.mubr.f32.vlgmr.msra.gmra.mrb[2].mxu1 %v2877_v4 }
  0x1b   :  { %2671 = vmatpush3.bf16.msra.mxu1 %v2963_v18  ;;  %2450 = vmatprep.mubr.msk.f32.mxu1 %vm2876_vm1, %v2877_v4 }
  0x1c   :  { %2672 = vmatprep.subr.bf16.mxu1 %v2875_v1 }
  0x1f   :  { %2674 = vmatpush3.bf16.msra.mxu1 %v2967_v19 }
  0x20   :  { %2681 = vmatprep.subr.bf16.mxu1 %v2875_v1 }
  0xde   :  { %v2987_v25 = vpop.f32.mrb[0].mxu0 }
  0xdf   :  { %v173_v26 = vpop.f32.mrb[1].mxu0 }
  0xe0   :  { %v174_v27 = vadd.f32 %v173_v26, %v2985_v24  ;;  %v67_v26 = vmul.f32 %v66_v22, %v2953_v11 }
  0xe2   :  { %v3084_v9 = vpop.f32.mrb[2].mxu0 }
  0xe3   :  { %v3086_v10 = vpop.f32.mrb[3].mxu0 }
  0xe5   :  { %v281_v28 = vpop.f32.mrb[0].mxu1 }
  0xe6   :  { %v285_v29 = vadd.f32 %v281_v28, %v174_v27  ;;  %v2419_v30 = vpop.f32.mrb[1].mxu1  ;;  %v179_v27 = vadd.f32 %v2987_v25, %v2985_v24  ;;  %v3116_v28 = vrot.slane %v67_v26, %v79_v23 }
  0xe7   :  { %v3088_v12 = vpop.f32.mrb[4].mxu0 }
  0xe8   :  { %v2225_v31 = vmul.f32 -1.442695, %v285_v29  ;;  %v3090_v13 = vpop.f32.mrb[5].mxu0 }
  0xea   :  { %2791 = vpow2.f32 %v2225_v31 }
  0xeb   :  { %v2408_v14 = vpop.f32.mrb[6].mxu0 }
  0xec   :  { %v3092_v15 = vpop.f32.mrb[7].mxu0 }
  0xed   :  { %v377_v16 = vpop.f32.mrb[2].mxu1 }
  0xee   :  { %v2430_v17 = vpop.f32.mrb[3].mxu1 }
  0xef   :  { %v184_v17 = vadd.f32 %v3086_v10, %v2985_v24 }
  0xf4   :  { %v2792_v32 = vpop.eup %2791 }
  0xf5   :  { %v289_v33 = vadd.f32 1.0, %v2792_v32 }
  0xf7   :  { %2793 = vrcp.f32 %v289_v33 }
 0x101   :  { %v2990_v34 = vpop.eup %2793 }
 0x102   :  { %v292_v35 = vmul.f32 2.0, %v2990_v34  ;;  %v294_v39 = vmul.f32 0.0, %v2990_v34 }
 0x104   :  { %v2226_v36 = vadd.f32 -1.0, %v292_v35 }
 0x106   :  { %296 = vrot.lane.b32.xlu0 %v2226_v36, %s2879_s3 }
 0x178   :  { %v297_v37 = vpop.permute.xlu0 %296 }
 0x179   :  { %v299_v38 = vmul.f32 %v2990_v34, %v297_v37 }
 0x17b   :  { %301 = vrot.lane.b32.xlu0 %v299_v38, %s2880_s23 }
 0x1ed   :  { %v302_v40 = vpop.permute.xlu0 %301 }
 0x1ee   :  { %v2997_v41 = vadd.f32 %v302_v40, %v294_v39 }
 0x1f0   :  { %2795 = vtanh.f32 %v2997_v41 }
 0x1fa   :  { %v2796_v6 = vpop.eup %2795 }
 0x1fb   :  { %307 = vrot.lane.b32.xlu1 %v2796_v6, %s2879_s3 }
 0x26d   :  { %v308_v7 = vpop.permute.xlu1 %307 }
 0x26e   :  { %v310_v8 = vmul.f32 %v2990_v34, %v308_v7 }
 0x270   :  { %382 = vrot.lane.b32.xlu1 %v310_v8, %s2880_s23 }
 0x2e2   :  { %v383_v21 = vpop.permute.xlu1 %382 }
 0x2e3   :  { %2440 = vmatmul.mubr.msk.f32.vlgmr.msra.gmra.mrb[8].mxu0 %vm211_vm5, %v383_v21  ;;  %2451 = vmatmul.mubr.msk.f32.vlgmr.msra.gmra.mrb[4].mxu1 %vm211_vm5, %v383_v21 }
 0x2e4   :  { %2683 = vmatpush3.bf16.msra.mxu1 %v3042_v59  ;;  %2677 = vmatpush3.bf16.msra.mxu0 %v3049_v63 }
 0x2e5   :  { %2684 = vmatprep.subr.bf16.mxu1 %v2875_v1  ;;  %2678 = vmatprep.subr.bf16.mxu0 %v2875_v1 }
 0x2e6   :  { %2472 = vmatprep.mubr.msk.f32.mxu1 %vm2876_vm1, %v2877_v4  ;;  %2461 = vmatprep.mubr.msk.f32.mxu0 %vm2876_vm1, %v2877_v4 }
 0x2e8   :  { %2686 = vmatpush3.bf16.msra.mxu1 %v3052_v0  ;;  %2680 = vmatpush3.bf16.msra.mxu0 %v3058_v3 }
 0x2e9   :  { %2687 = vmatprep.subr.bf16.mxu0 %v2875_v1  ;;  %2693 = vmatprep.subr.bf16.mxu1 %v2875_v1 }
 0x3b6   :  { %v452_v29 = vpop.f32.mrb[8].mxu0  ;;  %v554_v30 = vpop.f32.mrb[4].mxu1 }
 0x3b7   :  { %v453_v31 = vadd.f32 %v452_v29, %v377_v16  ;;  %v558_v32 = vadd.f32 %v554_v30, %v179_v27  ;;  %v2441_v33 = vpop.f32.mrb[9].mxu0  ;;  %v2452_v34 = vpop.f32.mrb[5].mxu1 }
 0x3b9   :  { %v462_v35 = vadd.f32 %v3116_v28, %v453_v31  ;;  %v2231_v36 = vmul.f32 -1.442695, %v558_v32 }
 0x3bb   :  { %v2228_v37 = vmul.f32 -1.442695, %v462_v35  ;;  %2797 = vpow2.f32 %v2231_v36 }
 0x3bd   :  { %2799 = vpow2.f32 %v2228_v37 }
 0x3c5   :  { %v2798_v11 = vpop.eup %2797 }
 0x3c6   :  { %v562_v38 = vadd.f32 1.0, %v2798_v11 }
 0x3c7   :  { %v2800_v39 = vpop.eup %2799 }
 0x3c8   :  { %v466_v25 = vadd.f32 1.0, %v2800_v39  ;;  %2801 = vrcp.f32 %v562_v38 }
 0x3ca   :  { %2803 = vrcp.f32 %v466_v25 }
 0x3d2   :  { %v2802_v20 = vpop.eup %2801 }
 0x3d3   :  { %v565_v23 = vmul.f32 2.0, %v2802_v20  ;;  %v567_v49 = vmul.f32 %v2802_v20, %v2997_v41 }
 0x3d4   :  { %v2804_v40 = vpop.eup %2803 }
 0x3d5   :  { %v2232_v42 = vadd.f32 -1.0, %v565_v23  ;;  %v469_v43 = vmul.f32 2.0, %v2804_v40  ;;  %v471_v52 = vmul.f32 0.0, %v2804_v40 }
 0x3d7   :  { %569 = vrot.lane.b32.xlu1 %v2232_v42, %s2879_s3  ;;  %v2229_v44 = vadd.f32 -1.0, %v469_v43 }
 0x3d9   :  { %473 = vrot.lane.b32.xlu0 %v2229_v44, %s2879_s3 }
 0x449   :  { %v570_v45 = vpop.permute.xlu1 %569 }
 0x44a   :  { %v572_v46 = vmul.f32 %v2802_v20, %v570_v45 }
 0x44b   :  { %v474_v47 = vpop.permute.xlu0 %473 }
 0x44c   :  { %v476_v48 = vmul.f32 %v2804_v40, %v474_v47  ;;  %574 = vrot.lane.b32.xlu1 %v572_v46, %s2880_s23 }
 0x44e   :  { %478 = vrot.lane.b32.xlu0 %v476_v48, %s2880_s23 }
 0x4be   :  { %v575_v50 = vpop.permute.xlu1 %574 }
 0x4bf   :  { %v3124_v51 = vadd.f32 %v575_v50, %v567_v49 }
 0x4c0   :  { %v479_v53 = vpop.permute.xlu0 %478 }
 0x4c1   :  { %2805 = vtanh.f32 %v3124_v51  ;;  %v3127_v54 = vadd.f32 %v479_v53, %v471_v52 }
 0x4c3   :  { %2807 = vtanh.f32 %v3127_v54 }
 0x4cb   :  { %v2806_v55 = vpop.eup %2805 }
 0x4cc   :  { %580 = vrot.lane.b32.xlu1 %v2806_v55, %s2879_s3 }
 0x4cd   :  { %v2808_v56 = vpop.eup %2807 }
 0x4ce   :  { %484 = vrot.lane.b32.xlu0 %v2808_v56, %s2879_s3  ;;  %v189_v56 = vadd.f32 %v3084_v9, %v2985_v24 }
 0x53e   :  { %v581_v57 = vpop.permute.xlu1 %580 }
 0x53f   :  { %v583_v58 = vmul.f32 %v2802_v20, %v581_v57 }
 0x540   :  { %v485_v41 = vpop.permute.xlu0 %484 }
 0x541   :  { %v487_v60 = vmul.f32 %v2804_v40, %v485_v41  ;;  %660 = vrot.lane.b32.xlu1 %v583_v58, %s2880_s23 }
 0x543   :  { %585 = vrot.lane.b32.xlu0 %v487_v60, %s2880_s23 }
 0x5b3   :  { %v661_v61 = vpop.permute.xlu1 %660 }
 0x5b4   :  { %2473 = vmatmul.mubr.msk.f32.vlgmr.msra.gmra.mrb[6].mxu1 %vm211_vm5, %v661_v61 }
 0x5b5   :  { %v586_v62 = vpop.permute.xlu0 %585  ;;  %2695 = vmatpush3.bf16.msra.mxu1 %v3049_v63  ;;  %2494 = vmatprep.mubr.msk.f32.mxu1 %vm2876_vm1, %v2877_v4 }
 0x5b6   :  { %2462 = vmatmul.mubr.msk.f32.vlgmr.msra.gmra.mrb[10].mxu0 %vm211_vm5, %v586_v62  ;;  %2696 = vmatprep.subr.bf16.mxu1 %v2875_v1 }
 0x5b7   :  { %2689 = vmatpush3.bf16.msra.mxu0 %v2963_v18  ;;  %2483 = vmatprep.mubr.msk.f32.mxu0 %vm2876_vm1, %v2877_v4 }
 0x5b8   :  { %2690 = vmatprep.subr.bf16.mxu0 %v2875_v1 }
 0x5b9   :  { %2698 = vmatpush3.bf16.msra.mxu1 %v3058_v3 }
 0x5ba   :  { %2705 = vmatprep.subr.bf16.mxu1 %v2875_v1 }
 0x5bb   :  { %2692 = vmatpush3.bf16.msra.mxu0 %v2967_v19 }
 0x5bc   :  { %2699 = vmatprep.subr.bf16.mxu0 %v2875_v1 }
 0x5be   :  { %2484 = vmatmul.mubr.msk.f32.vlgmr.msra.gmra.mrb[12].mxu0 %vm211_vm5, %v661_v61 }
 0x5bf   :  { %2701 = vmatpush3.bf16.msra.mxu0 %v3042_v59  ;;  %2505 = vmatprep.mubr.msk.f32.mxu0 %vm2876_vm1, %v2877_v4 }
 0x5c0   :  { %2702 = vmatprep.subr.bf16.mxu0 %v2875_v1 }
 0x5c3   :  { %2704 = vmatpush3.bf16.msra.mxu0 %v3052_v0 }
 0x5c4   :  { %2711 = vmatprep.subr.bf16.mxu0 %v2875_v1 }
 0x687   :  { %v730_v2 = vpop.f32.mrb[6].mxu1 }
 0x688   :  { %v2474_v5 = vpop.f32.mrb[7].mxu1 }
 0x689   :  { %v655_v6 = vpop.f32.mrb[10].mxu0 }
 0x68a   :  { %v731_v7 = vadd.f32 %v730_v2, %v655_v6  ;;  %v2463_v8 = vpop.f32.mrb[11].mxu0 }
 0x68c   :  { %v734_v14 = vadd.f32 %v731_v7, %v3116_v28 }
 0x68e   :  { %v2235_v16 = vmul.f32 -1.442695, %v734_v14 }
 0x690   :  { %2809 = vpow2.f32 %v2235_v16 }
 0x691   :  { %v826_v21 = vpop.f32.mrb[12].mxu0 }
 0x692   :  { %v830_v22 = vadd.f32 %v826_v21, %v184_v17  ;;  %v2485_v26 = vpop.f32.mrb[13].mxu0 }
 0x694   :  { %v2238_v27 = vmul.f32 -1.442695, %v830_v22 }
 0x696   :  { %2811 = vpow2.f32 %v2238_v27 }
 0x69a   :  { %v2810_v29 = vpop.eup %2809 }
 0x69b   :  { %v738_v30 = vadd.f32 1.0, %v2810_v29 }
 0x69d   :  { %2813 = vrcp.f32 %v738_v30 }
 0x6a0   :  { %v2812_v31 = vpop.eup %2811 }
 0x6a1   :  { %v834_v32 = vadd.f32 1.0, %v2812_v31 }
 0x6a3   :  { %2815 = vrcp.f32 %v834_v32 }
 0x6a7   :  { %v2814_v33 = vpop.eup %2813 }
 0x6a8   :  { %v741_v34 = vmul.f32 2.0, %v2814_v33  ;;  %v743_v20 = vmul.f32 %v2814_v33, %v3127_v54 }
 0x6aa   :  { %v2236_v35 = vadd.f32 -1.0, %v741_v34 }
 0x6ac   :  { %745 = vrot.lane.b32.xlu0 %v2236_v35, %s2879_s3 }
 0x6ad   :  { %v2816_v36 = vpop.eup %2815 }
 0x6ae   :  { %v837_v37 = vmul.f32 2.0, %v2816_v36  ;;  %v839_v42 = vmul.f32 %v2816_v36, %v3124_v51 }
 0x6b0   :  { %v2239_v10 = vadd.f32 -1.0, %v837_v37 }
 0x6b2   :  { %841 = vrot.lane.b32.xlu1 %v2239_v10, %s2879_s3 }
 0x71e   :  { %v746_v11 = vpop.permute.xlu0 %745 }
 0x71f   :  { %v748_v38 = vmul.f32 %v2814_v33, %v746_v11 }
 0x721   :  { %750 = vrot.lane.b32.xlu0 %v748_v38, %s2880_s23 }
 0x724   :  { %v842_v39 = vpop.permute.xlu1 %841 }
 0x725   :  { %v844_v25 = vmul.f32 %v2816_v36, %v842_v39 }
 0x727   :  { %846 = vrot.lane.b32.xlu1 %v844_v25, %s2880_s23 }
 0x793   :  { %v751_v23 = vpop.permute.xlu0 %750 }
 0x794   :  { %v3163_v40 = vadd.f32 %v751_v23, %v743_v20 }
 0x796   :  { %2817 = vtanh.f32 %v3163_v40 }
 0x799   :  { %v847_v43 = vpop.permute.xlu1 %846 }
 0x79a   :  { %v3167_v44 = vadd.f32 %v847_v43, %v839_v42 }
 0x79c   :  { %2819 = vtanh.f32 %v3167_v44 }
 0x7a0   :  { %v2818_v45 = vpop.eup %2817 }
 0x7a1   :  { %756 = vrot.lane.b32.xlu0 %v2818_v45, %s2879_s3 }
 0x7a6   :  { %v2820_v46 = vpop.eup %2819 }
 0x7a7   :  { %852 = vrot.lane.b32.xlu1 %v2820_v46, %s2879_s3 }
 0x813   :  { %v757_v47 = vpop.permute.xlu0 %756 }
 0x814   :  { %v759_v48 = vmul.f32 %v2814_v33, %v757_v47 }
 0x816   :  { %857 = vrot.lane.b32.xlu0 %v759_v48, %s2880_s23 }
 0x819   :  { %v853_v49 = vpop.permute.xlu1 %852 }
 0x81a   :  { %v855_v50 = vmul.f32 %v2816_v36, %v853_v49  ;;  %v194_v49 = vadd.f32 %v3090_v13, %v2985_v24 }
 0x81c   :  { %932 = vrot.lane.b32.xlu1 %v855_v50, %s2880_s23 }
 0x888   :  { %v858_v51 = vpop.permute.xlu0 %857 }
 0x889   :  { %2495 = vmatmul.mubr.msk.f32.vlgmr.msra.gmra.mrb[8].mxu1 %vm211_vm5, %v858_v51 }
 0x88a   :  { %2707 = vmatpush3.bf16.msra.mxu1 %v2963_v18  ;;  %2516 = vmatprep.mubr.msk.f32.mxu1 %vm2876_vm1, %v2877_v4 }
 0x88b   :  { %2708 = vmatprep.subr.bf16.mxu1 %v2875_v1 }
 0x88e   :  { %2710 = vmatpush3.bf16.msra.mxu1 %v2967_v19  ;;  %v933_v52 = vpop.permute.xlu1 %932 }
 0x88f   :  { %2506 = vmatmul.mubr.msk.f32.vlgmr.msra.gmra.mrb[14].mxu0 %vm211_vm5, %v933_v52  ;;  %2717 = vmatprep.subr.bf16.mxu1 %v2875_v1 }
 0x890   :  { %2713 = vmatpush3.bf16.msra.mxu0 %v3049_v63  ;;  %2527 = vmatprep.mubr.msk.f32.mxu0 %vm2876_vm1, %v2877_v4 }
 0x891   :  { %2517 = vmatmul.mubr.msk.f32.vlgmr.msra.gmra.mrb[10].mxu1 %vm211_vm5, %v933_v52  ;;  %2714 = vmatprep.subr.bf16.mxu0 %v2875_v1 }
 0x892   :  { %2719 = vmatpush3.bf16.msra.mxu1 %v3042_v59  ;;  %2538 = vmatprep.mubr.msk.f32.mxu1 %vm2876_vm1, %v2877_v4 }
 0x893   :  { %2720 = vmatprep.subr.bf16.mxu1 %v2875_v1 }
 0x894   :  { %2716 = vmatpush3.bf16.msra.mxu0 %v3058_v3 }
 0x895   :  { %2723 = vmatprep.subr.bf16.mxu0 %v2875_v1 }
 0x896   :  { %2722 = vmatpush3.bf16.msra.mxu1 %v3052_v0 }
 0x897   :  { %2729 = vmatprep.subr.bf16.mxu1 %v2875_v1 }
 0x95c   :  { %v927_v53 = vpop.f32.mrb[8].mxu1 }
 0x95d   :  { %v2496_v54 = vpop.f32.mrb[9].mxu1 }
 0x962   :  { %v1002_v55 = vpop.f32.mrb[14].mxu0 }
 0x963   :  { %v1003_v57 = vadd.f32 %v1002_v55, %v927_v53  ;;  %v2507_v58 = vpop.f32.mrb[15].mxu0 }
 0x964   :  { %v1098_v41 = vpop.f32.mrb[10].mxu1 }
 0x965   :  { %v1006_v60 = vadd.f32 %v1003_v57, %v3116_v28  ;;  %v1102_v61 = vadd.f32 %v1098_v41, %v189_v56  ;;  %v2518_v62 = vpop.f32.mrb[11].mxu1 }
 0x967   :  { %v2242_v2 = vmul.f32 -1.442695, %v1006_v60  ;;  %v2245_v5 = vmul.f32 -1.442695, %v1102_v61 }
 0x969   :  { %2821 = vpow2.f32 %v2242_v2 }
 0x96a   :  { %2823 = vpow2.f32 %v2245_v5 }
 0x973   :  { %v2822_v6 = vpop.eup %2821 }
 0x974   :  { %v2824_v7 = vpop.eup %2823  ;;  %v1010_v8 = vadd.f32 1.0, %v2822_v6 }
 0x975   :  { %v1106_v14 = vadd.f32 1.0, %v2824_v7 }
 0x976   :  { %2825 = vrcp.f32 %v1010_v8 }
 0x977   :  { %2827 = vrcp.f32 %v1106_v14 }
 0x980   :  { %v2826_v16 = vpop.eup %2825 }
 0x981   :  { %v2828_v17 = vpop.eup %2827  ;;  %v1013_v9 = vmul.f32 2.0, %v2826_v16  ;;  %v1015_v32 = vmul.f32 %v2826_v16, %v3163_v40 }
 0x982   :  { %v1109_v21 = vmul.f32 2.0, %v2828_v17  ;;  %v1111_v33 = vmul.f32 %v2828_v17, %v3167_v44 }
 0x983   :  { %v2243_v22 = vadd.f32 -1.0, %v1013_v9 }
 0x984   :  { %v2246_v26 = vadd.f32 -1.0, %v1109_v21 }
 0x985   :  { %1017 = vrot.lane.b32.xlu0 %v2243_v22, %s2879_s3 }
 0x986   :  { %1113 = vrot.lane.b32.xlu1 %v2246_v26, %s2879_s3 }
 0x9f7   :  { %v1018_v27 = vpop.permute.xlu0 %1017 }
 0x9f8   :  { %v1114_v29 = vpop.permute.xlu1 %1113  ;;  %v1020_v30 = vmul.f32 %v2826_v16, %v1018_v27 }
 0x9f9   :  { %v1116_v31 = vmul.f32 %v2828_v17, %v1114_v29 }
 0x9fa   :  { %1022 = vrot.lane.b32.xlu0 %v1020_v30, %s2880_s23 }
 0x9fb   :  { %1118 = vrot.lane.b32.xlu1 %v1116_v31, %s2880_s23 }
 0xa6c   :  { %v1023_v34 = vpop.permute.xlu0 %1022 }
 0xa6d   :  { %v1119_v35 = vpop.permute.xlu1 %1118  ;;  %v3204_v36 = vadd.f32 %v1023_v34, %v1015_v32 }
 0xa6e   :  { %v3206_v37 = vadd.f32 %v1119_v35, %v1111_v33 }
 0xa6f   :  { %2829 = vtanh.f32 %v3204_v36 }
 0xa70   :  { %2831 = vtanh.f32 %v3206_v37 }
 0xa79   :  { %v2830_v10 = vpop.eup %2829 }
 0xa7a   :  { %v2832_v11 = vpop.eup %2831  ;;  %1028 = vrot.lane.b32.xlu0 %v2830_v10, %s2879_s3 }
 0xa7b   :  { %1124 = vrot.lane.b32.xlu1 %v2832_v11, %s2879_s3  ;;  %v199_v11 = vadd.f32 %v3088_v12, %v2985_v24 }
 0xaec   :  { %v1029_v38 = vpop.permute.xlu0 %1028 }
 0xaed   :  { %v1125_v39 = vpop.permute.xlu1 %1124  ;;  %v1031_v25 = vmul.f32 %v2826_v16, %v1029_v38 }
 0xaee   :  { %v1127_v20 = vmul.f32 %v2828_v17, %v1125_v39 }
 0xaef   :  { %1129 = vrot.lane.b32.xlu0 %v1031_v25, %s2880_s23 }
 0xaf0   :  { %1204 = vrot.lane.b32.xlu1 %v1127_v20, %s2880_s23 }
 0xb61   :  { %v3214_v23 = vpop.permute.xlu0 %1129 }
 0xb62   :  { %v1205_v40 = vpop.permute.xlu1 %1204  ;;  %2528 = vmatmul.mubr.msk.f32.vlgmr.msra.gmra.mrb[16].mxu0 %vm211_vm5, %v3214_v23 }
 0xb63   :  { %2539 = vmatmul.mubr.msk.f32.vlgmr.msra.gmra.mrb[12].mxu1 %vm211_vm5, %v1205_v40  ;;  %2725 = vmatpush3.bf16.msra.mxu0 %v2963_v18 }
 0xb64   :  { %2726 = vmatprep.subr.bf16.mxu0 %v2875_v1  ;;  %2549 = vmatprep.mubr.msk.f32.mxu0 %vm2876_vm1, %v2877_v4 }
 0xb65   :  { %2731 = vmatpush3.bf16.msra.mxu1 %v3049_v63  ;;  %2560 = vmatprep.mubr.msk.f32.mxu1 %vm2876_vm1, %v2877_v4 }
 0xb66   :  { %2732 = vmatprep.subr.bf16.mxu1 %v2875_v1 }
 0xb67   :  { %2728 = vmatpush3.bf16.msra.mxu0 %v2967_v19 }
 0xb68   :  { %2735 = vmatprep.subr.bf16.mxu0 %v2875_v1 }
 0xb69   :  { %2734 = vmatpush3.bf16.msra.mxu1 %v3058_v3 }
 0xb6a   :  { %2550 = vmatmul.mubr.msk.f32.vlgmr.msra.gmra.mrb[18].mxu0 %vm211_vm5, %v1205_v40  ;;  %2741 = vmatprep.subr.bf16.mxu1 %v2875_v1 }
 0xb6b   :  { %2737 = vmatpush3.bf16.msra.mxu0 %v3042_v59  ;;  %2571 = vmatprep.mubr.msk.f32.mxu0 %vm2876_vm1, %v2877_v4 }
 0xb6c   :  { %2738 = vmatprep.subr.bf16.mxu0 %v2875_v1 }
 0xb6f   :  { %2740 = vmatpush3.bf16.msra.mxu0 %v3052_v0 }
 0xb70   :  { %2747 = vmatprep.subr.bf16.mxu0 %v2875_v1 }
 0xc35   :  { %v1199_v42 = vpop.f32.mrb[16].mxu0 }
 0xc36   :  { %v1274_v43 = vpop.f32.mrb[12].mxu1  ;;  %v2529_v44 = vpop.f32.mrb[17].mxu0 }
 0xc37   :  { %v1275_v45 = vadd.f32 %v1274_v43, %v1199_v42  ;;  %v2540_v46 = vpop.f32.mrb[13].mxu1 }
 0xc39   :  { %v1278_v47 = vadd.f32 %v1275_v45, %v3116_v28 }
 0xc3b   :  { %v2249_v48 = vmul.f32 -1.442695, %v1278_v47 }
 0xc3d   :  { %2833 = vpow2.f32 %v2249_v48  ;;  %v1370_v50 = vpop.f32.mrb[18].mxu0 }
 0xc3e   :  { %v1374_v51 = vadd.f32 %v1370_v50, %v194_v49  ;;  %v2551_v52 = vpop.f32.mrb[19].mxu0 }
 0xc40   :  { %v2252_v53 = vmul.f32 -1.442695, %v1374_v51 }
 0xc42   :  { %2835 = vpow2.f32 %v2252_v53 }
 0xc47   :  { %v2834_v54 = vpop.eup %2833 }
 0xc48   :  { %v1282_v55 = vadd.f32 1.0, %v2834_v54 }
 0xc4a   :  { %2837 = vrcp.f32 %v1282_v55 }
 0xc4c   :  { %v2836_v56 = vpop.eup %2835 }
 0xc4d   :  { %v1378_v57 = vadd.f32 1.0, %v2836_v56 }
 0xc4f   :  { %2839 = vrcp.f32 %v1378_v57 }
 0xc54   :  { %v2838_v58 = vpop.eup %2837 }
 0xc55   :  { %v1285_v41 = vmul.f32 2.0, %v2838_v58  ;;  %v1287_v8 = vmul.f32 %v2838_v58, %v3204_v36 }
 0xc57   :  { %v2250_v60 = vadd.f32 -1.0, %v1285_v41 }
 0xc59   :  { %v2840_v61 = vpop.eup %2839  ;;  %1289 = vrot.lane.b32.xlu0 %v2250_v60, %s2879_s3 }
 0xc5a   :  { %v1381_v62 = vmul.f32 2.0, %v2840_v61  ;;  %v1383_v17 = vmul.f32 %v2840_v61, %v3206_v37 }
 0xc5c   :  { %v2253_v13 = vadd.f32 -1.0, %v1381_v62 }
 0xc5e   :  { %1385 = vrot.lane.b32.xlu1 %v2253_v13, %s2879_s3 }
 0xccb   :  { %v1290_v2 = vpop.permute.xlu0 %1289 }
 0xccc   :  { %v1292_v5 = vmul.f32 %v2838_v58, %v1290_v2 }
 0xcce   :  { %1294 = vrot.lane.b32.xlu0 %v1292_v5, %s2880_s23 }
 0xcd0   :  { %v1386_v6 = vpop.permute.xlu1 %1385 }
 0xcd1   :  { %v1388_v7 = vmul.f32 %v2840_v61, %v1386_v6 }
 0xcd3   :  { %1390 = vrot.lane.b32.xlu1 %v1388_v7, %s2880_s23 }
 0xd40   :  { %v1295_v14 = vpop.permute.xlu0 %1294 }
 0xd41   :  { %v3246_v16 = vadd.f32 %v1295_v14, %v1287_v8 }
 0xd43   :  { %2841 = vtanh.f32 %v3246_v16 }
 0xd45   :  { %v1391_v9 = vpop.permute.xlu1 %1390 }
 0xd46   :  { %v3250_v21 = vadd.f32 %v1391_v9, %v1383_v17 }
 0xd48   :  { %2843 = vtanh.f32 %v3250_v21 }
 0xd4d   :  { %v2842_v22 = vpop.eup %2841 }
 0xd4e   :  { %1300 = vrot.lane.b32.xlu0 %v2842_v22, %s2879_s3 }
 0xd52   :  { %v2844_v26 = vpop.eup %2843 }
 0xd53   :  { %1396 = vrot.lane.b32.xlu1 %v2844_v26, %s2879_s3 }
 0xdc0   :  { %v1301_v27 = vpop.permute.xlu0 %1300 }
 0xdc1   :  { %v1303_v29 = vmul.f32 %v2838_v58, %v1301_v27 }
 0xdc3   :  { %1401 = vrot.lane.b32.xlu0 %v1303_v29, %s2880_s23 }
 0xdc5   :  { %v1397_v30 = vpop.permute.xlu1 %1396 }
 0xdc6   :  { %v1399_v31 = vmul.f32 %v2840_v61, %v1397_v30 }
 0xdc8   :  { %1476 = vrot.lane.b32.xlu1 %v1399_v31, %s2880_s23 }
 0xe35   :  { %v1402_v32 = vpop.permute.xlu0 %1401 }
 0xe36   :  { %2561 = vmatmul.mubr.msk.f32.vlgmr.msra.gmra.mrb[14].mxu1 %vm211_vm5, %v1402_v32 }
 0xe37   :  { %2743 = vmatpush3.bf16.msra.mxu1 %v2963_v18  ;;  %2582 = vmatprep.mubr.msk.f32.mxu1 %vm2876_vm1, %v2877_v4 }
 0xe38   :  { %2744 = vmatprep.subr.bf16.mxu1 %v2875_v1 }
 0xe3a   :  { %v1477_v33 = vpop.permute.xlu1 %1476 }
 0xe3b   :  { %2746 = vmatpush3.bf16.msra.mxu1 %v2967_v19  ;;  %2572 = vmatmul.mubr.msk.f32.vlgmr.msra.gmra.mrb[20].mxu0 %vm211_vm5, %v1477_v33 }
 0xe3c   :  { %2749 = vmatpush3.bf16.msra.mxu0 %v3049_v63  ;;  %2753 = vmatprep.subr.bf16.mxu1 %v2875_v1 }
 0xe3d   :  { %2750 = vmatprep.subr.bf16.mxu0 %v2875_v1  ;;  %2593 = vmatprep.mubr.msk.f32.mxu0 %vm2876_vm1, %v2877_v4 }
 0xe3e   :  { %2583 = vmatmul.mubr.msk.f32.vlgmr.msra.gmra.mrb[16].mxu1 %vm211_vm5, %v1477_v33 }
 0xe3f   :  { %2755 = vmatpush3.bf16.msra.mxu1 %v3042_v59  ;;  %2604 = vmatprep.mubr.msk.f32.mxu1 %vm2876_vm1, %v2877_v4 }
 0xe40   :  { %2752 = vmatpush3.bf16.msra.mxu0 %v3058_v3  ;;  %2756 = vmatprep.subr.bf16.mxu1 %v2875_v1 }
 0xe41   :  { %2759 = vmatprep.subr.bf16.mxu0 %v2875_v1 }
 0xe43   :  { %2758 = vmatpush3.bf16.msra.mxu1 %v3052_v0 }
 0xe44   :  { %2765 = vmatprep.subr.bf16.mxu1 %v2875_v1 }
 0xf09   :  { %v1471_v34 = vpop.f32.mrb[14].mxu1 }
 0xf0a   :  { %v2562_v35 = vpop.f32.mrb[15].mxu1 }
 0xf0e   :  { %v1546_v36 = vpop.f32.mrb[20].mxu0 }
 0xf0f   :  { %v1547_v37 = vadd.f32 %v1546_v36, %v1471_v34  ;;  %v2573_v10 = vpop.f32.mrb[21].mxu0 }
 0xf11   :  { %v1550_v38 = vadd.f32 %v1547_v37, %v3116_v28  ;;  %v1642_v39 = vpop.f32.mrb[16].mxu1 }
 0xf12   :  { %v1646_v25 = vadd.f32 %v1642_v39, %v199_v11  ;;  %v2584_v20 = vpop.f32.mrb[17].mxu1 }
 0xf13   :  { %v2256_v40 = vmul.f32 -1.442695, %v1550_v38 }
 0xf14   :  { %v2259_v42 = vmul.f32 -1.442695, %v1646_v25 }
 0xf15   :  { %2845 = vpow2.f32 %v2256_v40 }
 0xf16   :  { %2847 = vpow2.f32 %v2259_v42 }
 0xf1f   :  { %v2846_v43 = vpop.eup %2845 }
 0xf20   :  { %v2848_v44 = vpop.eup %2847  ;;  %v1554_v45 = vadd.f32 1.0, %v2846_v43 }
 0xf21   :  { %v1650_v46 = vadd.f32 1.0, %v2848_v44 }
 0xf22   :  { %2849 = vrcp.f32 %v1554_v45 }
 0xf23   :  { %2851 = vrcp.f32 %v1650_v46 }
 0xf2c   :  { %v2850_v47 = vpop.eup %2849 }
 0xf2d   :  { %v2852_v48 = vpop.eup %2851  ;;  %v1557_v49 = vmul.f32 2.0, %v2850_v47  ;;  %v1559_v56 = vmul.f32 %v2850_v47, %v3246_v16 }
 0xf2e   :  { %v1653_v50 = vmul.f32 2.0, %v2852_v48  ;;  %v1655_v57 = vmul.f32 %v2852_v48, %v3250_v21 }
 0xf2f   :  { %v2257_v12 = vadd.f32 -1.0, %v1557_v49 }
 0xf30   :  { %v2260_v51 = vadd.f32 -1.0, %v1653_v50 }
 0xf31   :  { %1561 = vrot.lane.b32.xlu0 %v2257_v12, %s2879_s3 }
 0xf32   :  { %1657 = vrot.lane.b32.xlu1 %v2260_v51, %s2879_s3 }
 0xfa3   :  { %v1562_v52 = vpop.permute.xlu0 %1561 }
 0xfa4   :  { %v1658_v53 = vpop.permute.xlu1 %1657  ;;  %v1564_v54 = vmul.f32 %v2850_v47, %v1562_v52 }
 0xfa5   :  { %v1660_v55 = vmul.f32 %v2852_v48, %v1658_v53 }
 0xfa6   :  { %1566 = vrot.lane.b32.xlu0 %v1564_v54, %s2880_s23 }
 0xfa7   :  { %1662 = vrot.lane.b32.xlu1 %v1660_v55, %s2880_s23 }
0x1018   :  { %v1567_v58 = vpop.permute.xlu0 %1566 }
0x1019   :  { %v1663_v41 = vpop.permute.xlu1 %1662  ;;  %v3287_v60 = vadd.f32 %v1567_v58, %v1559_v56 }
0x101a   :  { %v3289_v61 = vadd.f32 %v1663_v41, %v1655_v57 }
0x101b   :  { %2853 = vtanh.f32 %v3287_v60 }
0x101c   :  { %2855 = vtanh.f32 %v3289_v61 }
0x1025   :  { %v2854_v62 = vpop.eup %2853 }
0x1026   :  { %v2856_v13 = vpop.eup %2855  ;;  %1572 = vrot.lane.b32.xlu0 %v2854_v62, %s2879_s3 }
0x1027   :  { %1668 = vrot.lane.b32.xlu1 %v2856_v13, %s2879_s3 }
0x1098   :  { %v1573_v2 = vpop.permute.xlu0 %1572 }
0x1099   :  { %v1669_v5 = vpop.permute.xlu1 %1668  ;;  %v1575_v6 = vmul.f32 %v2850_v47, %v1573_v2  ;;  %v2121_v2 = vld [vmem:[%s3367_s7 + $0x8] sm:$0xff] }
0x109a   :  { %v1671_v7 = vmul.f32 %v2852_v48, %v1669_v5  ;;  %v2122_v5 = vld [vmem:[%s3367_s7 + $0x10] sm:$0xff] }
0x109b   :  { %1673 = vrot.lane.b32.xlu0 %v1575_v6, %s2880_s23 }
0x109c   :  { %1748 = vrot.lane.b32.xlu1 %v1671_v7, %s2880_s23  ;;  %v2123_v7 = vld [vmem:[%s3367_s7 + $0x18] sm:$0xff] }
0x110d   :  { %v1674_v8 = vpop.permute.xlu0 %1673 }
0x110e   :  { %v1749_v14 = vpop.permute.xlu1 %1748  ;;  %2594 = vmatmul.mubr.msk.f32.vlgmr.msra.gmra.mrb[22].mxu0 %vm211_vm5, %v1674_v8  ;;  %v2781_v8 = vpack.c.bf16 %v2123_v7, %v2122_v5 }
0x110f   :  { %2605 = vmatmul.mubr.msk.f32.vlgmr.msra.gmra.mrb[18].mxu1 %vm211_vm5, %v1749_v14  ;;  %2761 = vmatpush3.bf16.msra.mxu0 %v2963_v18 }
0x1110   :  { %2762 = vmatprep.subr.bf16.mxu0 %v2875_v1  ;;  %2615 = vmatprep.mubr.msk.f32.mxu0 %vm2876_vm1, %v2877_v4 }
0x1111   :  { %2767 = vmatpush3.bf16.msra.mxu1 %v3049_v63  ;;  %2626 = vmatprep.mubr.msk.f32.mxu1 %vm2876_vm1, %v2877_v4 }
0x1112   :  { %2768 = vmatprep.subr.bf16.mxu1 %v2875_v1 }
0x1113   :  { %2764 = vmatpush3.bf16.msra.mxu0 %v2967_v19 }
0x1114   :  { %2771 = vmatprep.subr.bf16.mxu0 %v2875_v1 }
0x1115   :  { %2770 = vmatpush3.bf16.msra.mxu1 %v3058_v3  ;;  %v204_v3 = vadd.f32 %v3092_v15, %v2985_v24 }
0x1116   :  { %2616 = vmatmul.mubr.msk.f32.vlgmr.msra.gmra.mrb[24].mxu0 %vm211_vm5, %v1749_v14 }
0x1117   :  { %2773 = vmatpush3.bf16.msra.mxu0 %v3042_v59  ;;  %2637 = vmatprep.mubr.msk.f32.mxu0 %vm2876_vm1, %v2877_v4 }
0x1118   :  { %2774 = vmatprep.subr.bf16.mxu0 %v2875_v1 }
0x111b   :  { %2776 = vmatpush3.bf16.msra.mxu0 %v3052_v0 }
0x11e1   :  { %v1743_v18 = vpop.f32.mrb[22].mxu0 }
0x11e2   :  { %v1818_v63 = vpop.f32.mrb[18].mxu1  ;;  %v2595_v16 = vpop.f32.mrb[23].mxu0 }
0x11e3   :  { %v1819_v17 = vadd.f32 %v1818_v63, %v1743_v18  ;;  %v2606_v19 = vpop.f32.mrb[19].mxu1 }
0x11e5   :  { %v1822_v9 = vadd.f32 %v1819_v17, %v3116_v28  ;;  %v2272_v17 = vld [vmem:[%s3368_s8] ss:$0 sm:$0xff] }
0x11e7   :  { %v2263_v21 = vmul.f32 -1.442695, %v1822_v9 }
0x11e9   :  { %2857 = vpow2.f32 %v2263_v21  ;;  %v1914_v59 = vpop.f32.mrb[24].mxu0 }
0x11ea   :  { %v1918_v22 = vadd.f32 %v1914_v59, %v204_v3  ;;  %v2617_v26 = vpop.f32.mrb[25].mxu0 }
0x11ec   :  { %v2266_v4 = vmul.f32 -1.442695, %v1918_v22 }
0x11ee   :  { %2859 = vpow2.f32 %v2266_v4 }
0x11f3   :  { %v2858_v1 = vpop.eup %2857 }
0x11f4   :  { %v1826_v27 = vadd.f32 1.0, %v2858_v1 }
0x11f6   :  { %2861 = vrcp.f32 %v1826_v27 }
0x11f8   :  { %v2860_v0 = vpop.eup %2859 }
0x11f9   :  { %v1922_v29 = vadd.f32 1.0, %v2860_v0 }
0x11fb   :  { %2863 = vrcp.f32 %v1922_v29 }
0x1200   :  { %v2862_v30 = vpop.eup %2861 }
0x1201   :  { %v1829_v31 = vmul.f32 2.0, %v2862_v30  ;;  %v1831_v10 = vmul.f32 %v2862_v30, %v3287_v60 }
0x1203   :  { %v2264_v32 = vadd.f32 -1.0, %v1829_v31 }
0x1205   :  { %v2864_v33 = vpop.eup %2863  ;;  %1833 = vrot.lane.b32.xlu0 %v2264_v32, %s2879_s3 }
0x1206   :  { %v1925_v34 = vmul.f32 2.0, %v2864_v33  ;;  %v1927_v39 = vmul.f32 %v2864_v33, %v3289_v61 }
0x1208   :  { %v2267_v24 = vadd.f32 -1.0, %v1925_v34 }
0x120a   :  { %1929 = vrot.lane.b32.xlu1 %v2267_v24, %s2879_s3 }
0x1277   :  { %v1834_v15 = vpop.permute.xlu0 %1833 }
0x1278   :  { %v1836_v35 = vmul.f32 %v2862_v30, %v1834_v15 }
0x127a   :  { %1838 = vrot.lane.b32.xlu0 %v1836_v35, %s2880_s23 }
0x127c   :  { %v1930_v36 = vpop.permute.xlu1 %1929 }
0x127d   :  { %v1932_v37 = vmul.f32 %v2864_v33, %v1930_v36 }
0x127f   :  { %1934 = vrot.lane.b32.xlu1 %v1932_v37, %s2880_s23 }
0x12ec   :  { %v1839_v11 = vpop.permute.xlu0 %1838 }
0x12ed   :  { %v1841_v38 = vadd.f32 %v1839_v11, %v1831_v10 }
0x12ef   :  { %2865 = vtanh.f32 %v1841_v38 }
0x12f1   :  { %v1935_v25 = vpop.permute.xlu1 %1934 }
0x12f2   :  { %v1937_v20 = vadd.f32 %v1935_v25, %v1927_v39 }
0x12f4   :  { %2867 = vtanh.f32 %v1937_v20 }
0x12f9   :  { %v2866_v40 = vpop.eup %2865 }
0x12fa   :  { %1844 = vrot.lane.b32.xlu0 %v2866_v40, %s2879_s3 }
0x12fe   :  { %v2868_v42 = vpop.eup %2867 }
0x12ff   :  { %1940 = vrot.lane.b32.xlu1 %v2868_v42, %s2879_s3 }
0x136c   :  { %v1845_v43 = vpop.permute.xlu0 %1844 }
0x136d   :  { %v1847_v44 = vmul.f32 %v2862_v30, %v1845_v43 }
0x136f   :  { %1945 = vrot.lane.b32.xlu0 %v1847_v44, %s2880_s23 }
0x1371   :  { %v1941_v45 = vpop.permute.xlu1 %1940 }
0x1372   :  { %v1943_v46 = vmul.f32 %v2864_v33, %v1941_v45 }
0x1374   :  { %2020 = vrot.lane.b32.xlu1 %v1943_v46, %s2880_s23 }
0x13e1   :  { %v1946_v47 = vpop.permute.xlu0 %1945 }
0x13e2   :  { %2627 = vmatmul.mubr.msk.f32.vlgmr.msra.gmra.mrb[20].mxu1 %vm211_vm5, %v1946_v47 }
0x13e3   :  { %2648 = vmatprep.mubr.msk.f32.mxu1 %vm211_vm5, %v3214_v23 }
0x13e6   :  { %v2021_v48 = vpop.permute.xlu1 %2020 }
0x13e7   :  { %2638 = vmatmul.mubr.msk.f32.vlgmr.msra.gmra.mrb[26].mxu0 %vm211_vm5, %v2021_v48 }
0x14b5   :  { %v2015_v49 = vpop.f32.mrb[20].mxu1 }
0x14b6   :  { %v2628_v50 = vpop.f32.mrb[21].mxu1 }
0x14ba   :  { %v2090_v12 = vpop.f32.mrb[26].mxu0 }
0x14bb   :  { %v2091_v51 = vadd.f32 %v2090_v12, %v2015_v49  ;;  %v2639_v52 = vpop.f32.mrb[27].mxu0 }
0x14bd   :  { %v2094_v53 = vadd.f32 %v2091_v51, %v3116_v28  ;;  %v2120_v28 = vld [vmem:[%s3367_s7] sm:$0xff] }
0x14be   :  { %v2777_v6 = vpack.c.bf16 %v2121_v2, %v2120_v28 }
0x14bf   :  { %v2270_v54 = vmul.f32 -1.442695, %v2094_v53 }
0x14c0   :  { %2778 = vmatprep.subr.bf16.mxu1 %v2777_v6 }
0x14c1   :  { %2869 = vpow2.f32 %v2270_v54  ;;  %2780 = vmatpush3.bf16.msra.mxu1 %v2777_v6 }
0x14c2   :  { %2782 = vmatprep.subr.bf16.mxu1 %v2781_v8 }
0x14c5   :  { %2784 = vmatpush3.bf16.msra.mxu1 %v2781_v8 }
0x14cb   :  { %v2870_v55 = vpop.eup %2869 }
0x14cc   :  { %v2098_v56 = vadd.f32 1.0, %v2870_v55 }
0x14ce   :  { %2871 = vrcp.f32 %v2098_v56 }
0x14d8   :  { %v2872_v57 = vpop.eup %2871 }
0x14d9   :  { %v2101_v58 = vmul.f32 2.0, %v2872_v57  ;;  %v2103_v61 = vmul.f32 %v2872_v57, %v1841_v38 }
0x14db   :  { %v2271_v41 = vadd.f32 -1.0, %v2101_v58 }
0x14dd   :  { %2105 = vrot.lane.b32.xlu0 %v2271_v41, %s2879_s3 }
0x154f   :  { %v2106_v23 = vpop.permute.xlu0 %2105 }
0x1550   :  { %v2108_v60 = vmul.f32 %v2872_v57, %v2106_v23 }
0x1552   :  { %2110 = vrot.lane.b32.xlu1 %v2108_v60, %s2880_s23 }
0x15c4   :  { %v2111_v62 = vpop.permute.xlu1 %2110 }
0x15c5   :  { %v2113_v13 = vadd.f32 %v2111_v62, %v2103_v61 }
0x15c7   :  { %2873 = vtanh.f32 %v2113_v13 }
0x15d1   :  { %v2874_v14 = vpop.eup %2873 }
0x15d2   :  { %2116 = vrot.lane.b32.xlu0 %v2874_v14, %s2879_s3 }
0x1644   :  { %v2117_v18 = vpop.permute.xlu0 %2116 }
0x1645   :  { %v2119_v63 = vmul.f32 %v2872_v57, %v2117_v18 }
0x1647   :  { %2132 = vrot.lane.b32.xlu1 %v2119_v63, %s2880_s23 }
0x16b9   :  { %v2133_v16 = vpop.permute.xlu1 %2132 }
0x16ba   :  { %2649 = vmatmul.mubr.msk.f32.vlgmr.msra.gmra.mrb[22].mxu1 %vm211_vm5, %v2133_v16 }
0x178d   :  { %v2650_v19 = vpop.f32.mrb[22].mxu1 }
0x178e   :  { %v2208_v9 = vadd.f32 %v2650_v19, %v2272_v17  ;;  %v2202_v21 = vpop.f32.mrb[23].mxu1 }
0x178f   :  { %v2203_v3 = vadd.f32 %v2272_v17, %v2202_v21 }
0x1790   :  { %2212 = vst [vmem:[%s3369_s9 + $0x8] sm:$0xff] %v2208_v9 }
0x1791   :  { %2211 = vst [vmem:[%s3369_s9] sm:$0xff] %v2203_v3 }

</bundles_post_ra>
